<compile_context>
chip_gen: v6e
topology: v6e:2x2x1
jax: 0.10.0
libtpu: 0.0.40
codegen_flags: <defaults>
</compile_context>

<pallas_src>
import numpy as np
import jax
import jax.numpy as jnp
from jax.experimental import pallas as pl
from jax.experimental.pallas import tpu as pltpu

# ---- architecture constants (fixed by the module: 36*20 flatten) -----------
IN_LEN  = 200                  # (200 - 21 + 1) / 5 = 36
IN_PAD  = 256                  # lane-dense x rows (200 -> 2*128)
K       = 21                   # conv kernel size
C_OUT   = 20                   # conv output channels
T_CONV  = IN_LEN - K + 1       # 180
POOL    = 5
T_POOL  = T_CONV // POOL       # 36
FC_IN   = T_POOL * C_OUT       # 720
FC_HID  = 100
FC_OUT  = 8

PAD     = 768                  # per-pool-phase column count (720 -> 6*128)
HID_PAD = 128                  # hidden 100 -> 128 lanes
OUT_PAD = 128                  # output 8 -> 128 lanes (sliced in wrapper)
B_TILE  = 512                  # ~4-5 MB live f32/bf16 intermediates per tile
                               # after fusing the pool into the conv dots ->
                               # fits the 32 MiB scoped-VMEM default on
                               # v5e/v6e/v7x without raising vmem_limit_bytes.


# ------------------------------- kernel --------------------------------------
def cnn1d_kernel(x_ref, wband_ref, bc_ref, w1_ref, b1_ref, w2_ref, b2_ref,
                 o_ref):
    x = x_ref[...]                                        # (Bt, 256) bf16

    # Conv1d(1,20,21) + MaxPool1d(5) fused: five per-phase lane-dense MXU dots
    # with a running elementwise max. Column c*36 + tp of phase p computes the
    # conv output at time t = 5*tp + p for channel c, so the full (Bt, 3840)
    # conv slab is never materialized — only a (Bt, 768) f32 accumulator.
    pooled = jnp.dot(x, wband_ref[0], preferred_element_type=jnp.float32)
    for p in range(1, POOL):
        pooled = jnp.maximum(
            pooled,
            jnp.dot(x, wband_ref[p], preferred_element_type=jnp.float32))

    # tanh is monotone and the conv bias is phase-invariant, so bias+tanh
    # commute with the max; columns are already in PyTorch flatten order
    # (c*36 + tp), so "flatten" is a no-op. bf16 activation feeds FC1 directly.
    act = jnp.tanh((pooled + bc_ref[...]).astype(jnp.bfloat16))   # (Bt, 768)

    h = jnp.tanh(jnp.dot(act, w1_ref[...],
                         preferred_element_type=jnp.float32) + b1_ref[...])
    out = jnp.tanh(jnp.dot(h.astype(w2_ref.dtype), w2_ref[...],
                           preferred_element_type=jnp.float32) + b2_ref[...])
    o_ref[...] = out.astype(o_ref.dtype)                  # (Bt, 128) bf16 dense


# ------------------------- host-side weight prep ------------------------------
def prepare_kernel_params(params, matmul_dtype=jnp.bfloat16):
    """PyTorch-layout params -> banded / lane-padded kernel params."""
    wc, bc, w1, b1, w2, b2 = (np.asarray(p, np.float32) for p in params)
    wc2 = wc.reshape(C_OUT, K)                            # (20, 21)

    # Banded conv weight, one (256, 768) slab per pool phase: column
    # c*36 + tp of phase p holds wc[c, :] at rows [5*tp+p, 5*tp+p+21)
    # (cross-correlation, like nn.Conv1d). Rows 200-255 stay zero (x pad).
    wband = np.zeros((POOL, IN_PAD, PAD), np.float32)
    for p in range(POOL):
        for c in range(C_OUT):
            for tp in range(T_POOL):
                t = POOL * tp + p
                wband[p, t:t + K, c * T_POOL + tp] = wc2[c]

    bc_band = np.zeros((1, PAD), np.float32)
    bc_band[0, :FC_IN] = np.repeat(bc, T_POOL)            # bc[c] at c*36 + tp

    w1_pad = np.zeros((PAD, HID_PAD), np.float32)         # padded rows/cols = 0
    w1_pad[:FC_IN, :FC_HID] = w1.T                        # nn.Linear (out,in)->(in,out)
    b1_pad = np.zeros((1, HID_PAD), np.float32)
    b1_pad[0, :FC_HID] = b1

    w2_pad = np.zeros((HID_PAD, OUT_PAD), np.float32)
    w2_pad[:FC_HID, :FC_OUT] = w2.T
    b2_pad = np.zeros((1, OUT_PAD), np.float32)
    b2_pad[0, :FC_OUT] = b2

    return (jnp.asarray(wband, matmul_dtype), jnp.asarray(bc_band),
            jnp.asarray(w1_pad, matmul_dtype), jnp.asarray(b1_pad),
            jnp.asarray(w2_pad, matmul_dtype), jnp.asarray(b2_pad))


# ------------------------------- wrapper --------------------------------------
def cnn1d_forward(x_ncw, kernel_params, *, b_tile=B_TILE):
    """x_ncw: (B, 1, 200) float32 (NCW, same convention as the PyTorch module)."""
    wband, bc_band, w1p, b1p, w2p, b2p = kernel_params
    B = x_ncw.shape[0]

    # bf16 input + 16-based batch rounding (bf16 sublane tile is 16).
    x = x_ncw.reshape(B, IN_LEN).astype(jnp.bfloat16)

    bt = min(b_tile, 16 * pl.cdiv(B, 16))
    if B > 16:
        # keep >= 2 grid steps so the "parallel" axis can shard across both
        # TensorCores on v7x (no-op for tiny batches).
        bt = min(bt, 16 * pl.cdiv(pl.cdiv(B, 2), 16))
    bt = max(bt, 16)
    b_pad = bt * pl.cdiv(B, bt)
    x = jnp.pad(x, ((0, b_pad - B), (0, IN_PAD - IN_LEN)))   # (b_pad, 256) bf16

    def resident(shape):
        # VMEM-resident weights: constant index_map + single buffer (never
        # refetched, so a second pipeline buffer would just waste VMEM).
        zeros = (0,) * len(shape)
        return pl.BlockSpec(shape, lambda i, z=zeros: z,
                            pipeline_mode=pl.Buffered(1))

    mm_bytes = (wband.size + w1p.size + w2p.size) * 2
    cost = pl.CostEstimate(
        flops=2 * b_pad * (POOL * IN_PAD * PAD + PAD * HID_PAD
                           + HID_PAD * OUT_PAD),
        transcendentals=b_pad * (PAD + HID_PAD + OUT_PAD),
        bytes_accessed=2 * b_pad * (IN_PAD + OUT_PAD) + mm_bytes,
    )

    out = pl.pallas_call(
        cnn1d_kernel,
        out_shape=jax.ShapeDtypeStruct((b_pad, OUT_PAD), jnp.bfloat16),
        grid=(b_pad // bt,),
        in_specs=[
            pl.BlockSpec((bt, IN_PAD), lambda i: (i, 0)),   # x batch tile (bf16)
            resident((POOL, IN_PAD, PAD)),                  # banded conv weight
            resident((1, PAD)),                             # conv bias band
            resident((PAD, HID_PAD)),                       # fc1 weight
            resident((1, HID_PAD)),                         # fc1 bias
            resident((HID_PAD, OUT_PAD)),                   # fc2 weight
            resident((1, OUT_PAD)),                         # fc2 bias
        ],
        out_specs=pl.BlockSpec((bt, OUT_PAD), lambda i: (i, 0)),
        compiler_params=pltpu.CompilerParams(
            dimension_semantics=("parallel",)),
        cost_estimate=cost,
    )(x, wband, bc_band, w1p, b1p, w2p, b2p)

    return out[:B, :FC_OUT].astype(jnp.float32)


# ---------------------- PyTorch-layout init + f32 reference -------------------
def init_params(key):
    """Deterministic PyTorch-style uniform(-1/sqrt(fan_in), 1/sqrt(fan_in))."""
    ks = jax.random.split(key, 6)

    def u(k, shape, fan_in):
        bound = 1.0 / float(fan_in) ** 0.5
        return jax.random.uniform(k, shape, jnp.float32, -bound, bound)

    wc = u(ks[0], (C_OUT, 1, K), K)           # Conv1d weight (20, 1, 21)
    bc = u(ks[1], (C_OUT,), K)                # Conv1d bias
    w1 = u(ks[2], (FC_HID, FC_IN), FC_IN)     # nn.Linear(720,100) weight (out,in)
    b1 = u(ks[3], (FC_HID,), FC_IN)
    w2 = u(ks[4], (FC_OUT, FC_HID), FC_HID)   # nn.Linear(100,8) weight (out,in)
    b2 = u(ks[5], (FC_OUT,), FC_HID)
    return wc, bc, w1, b1, w2, b2


def cnn1d_reference(x_ncw, params):
    """Pure-JAX f32 reference with PyTorch semantics (for correctness check)."""
    wc, bc, w1, b1, w2, b2 = params
    B = x_ncw.shape[0]
    x = x_ncw.reshape(B, IN_LEN)
    patches = jnp.stack([x[:, t:t + K] for t in range(T_CONV)], axis=1)  # (B,180,21)
    conv = jnp.einsum("btk,ck->bct", patches, wc.reshape(C_OUT, K))
    conv = jnp.tanh(conv + bc[None, :, None])                            # (B,20,180)
    pooled = conv.reshape(B, C_OUT, T_POOL, POOL).max(axis=-1)           # (B,20,36)
    flat = pooled.reshape(B, FC_IN)                                      # c*36 + tp
    h = jnp.tanh(flat @ w1.T + b1)
    return jnp.tanh(h @ w2.T + b2)


if __name__ == "__main__":
    root = jax.random.PRNGKey(0)
    k_x, k_p = jax.random.split(root)

    B = 2
    x = jax.random.normal(k_x, (B, 1, IN_LEN), dtype=jnp.float32)  # NCW input
    params = init_params(k_p)
    kparams = prepare_kernel_params(params)

    out = jax.block_until_ready(cnn1d_forward(x, kparams))

    assert out.shape == (B, FC_OUT) and out.dtype == jnp.float32
    assert bool(jnp.all(jnp.isfinite(out)))

    ref = cnn1d_reference(x, params)
    err = float(jnp.max(jnp.abs(out - ref)))
    assert err < 0.1, f"max abs err vs f32 reference: {err}"  # bf16 matmul/act tol
    print("KERNEL_OK")
</pallas_src>

<mosaic_0001>
module attributes {stable_mosaic.version = 11 : i64} {
  func.func @cnn1d_kernel(%arg0: i32, %arg1: memref<16x256xbf16, #tpu.memory_space<vmem>>, %arg2: memref<5x256x768xbf16, #tpu.memory_space<vmem>>, %arg3: memref<1x768xf32, #tpu.memory_space<vmem>>, %arg4: memref<768x128xbf16, #tpu.memory_space<vmem>>, %arg5: memref<1x128xf32, #tpu.memory_space<vmem>>, %arg6: memref<128x128xbf16, #tpu.memory_space<vmem>>, %arg7: memref<1x128xf32, #tpu.memory_space<vmem>>, %arg8: memref<16x128xbf16, #tpu.memory_space<vmem>>) attributes {dimension_semantics = [#tpu.dimension_semantics<parallel>], iteration_bounds = array<i64: 1>, scalar_prefetch = 0 : i64, scratch_operands = 0 : i64, tpu.core_type = #tpu.core_type<tc>, window_params = [{transform_indices = @transform_0, window_bounds = array<i64: 16, 256>}, {pipeline_mode = #tpu.pipeline_mode<synchronous>, transform_indices = @transform_1, window_bounds = array<i64: 5, 256, 768>}, {pipeline_mode = #tpu.pipeline_mode<synchronous>, transform_indices = @transform_2, window_bounds = array<i64: 1, 768>}, {pipeline_mode = #tpu.pipeline_mode<synchronous>, transform_indices = @transform_3, window_bounds = array<i64: 768, 128>}, {pipeline_mode = #tpu.pipeline_mode<synchronous>, transform_indices = @transform_4, window_bounds = array<i64: 1, 128>}, {pipeline_mode = #tpu.pipeline_mode<synchronous>, transform_indices = @transform_5, window_bounds = array<i64: 128, 128>}, {pipeline_mode = #tpu.pipeline_mode<synchronous>, transform_indices = @transform_6, window_bounds = array<i64: 1, 128>}, {transform_indices = @transform_7, window_bounds = array<i64: 16, 128>}]} {
    %c0 = arith.constant 0 : index
    %c0_0 = arith.constant 0 : index
    %0 = vector.load %arg1[%c0, %c0_0] : memref<16x256xbf16, #tpu.memory_space<vmem>>, vector<16x256xbf16>
    %c0_1 = arith.constant 0 : index
    %c0_2 = arith.constant 0 : index
    %c0_3 = arith.constant 0 : index
    %1 = vector.load %arg2[%c0_1, %c0_2, %c0_3] : memref<5x256x768xbf16, #tpu.memory_space<vmem>>, vector<1x256x768xbf16>
    %2 = vector.shape_cast %1 : vector<1x256x768xbf16> to vector<256x768xbf16>
    %cst = arith.constant dense<0.000000e+00> : vector<16x768xf32>
    %3 = tpu.matmul %0, %2, %cst {dimension_numbers = #tpu.dot_dimension_numbers<[1], [0], [0], [1], [0, 0, 1, 1], [], []>} : vector<16x256xbf16>, vector<256x768xbf16>, vector<16x768xf32> -> vector<16x768xf32>
    %c1 = arith.constant 1 : index
    %c0_4 = arith.constant 0 : index
    %c0_5 = arith.constant 0 : index
    %4 = vector.load %arg2[%c1, %c0_4, %c0_5] : memref<5x256x768xbf16, #tpu.memory_space<vmem>>, vector<1x256x768xbf16>
    %5 = vector.shape_cast %4 : vector<1x256x768xbf16> to vector<256x768xbf16>
    %cst_6 = arith.constant dense<0.000000e+00> : vector<16x768xf32>
    %6 = tpu.matmul %0, %5, %cst_6 {dimension_numbers = #tpu.dot_dimension_numbers<[1], [0], [0], [1], [0, 0, 1, 1], [], []>} : vector<16x256xbf16>, vector<256x768xbf16>, vector<16x768xf32> -> vector<16x768xf32>
    %7 = arith.maximumf %3, %6 : vector<16x768xf32>
    %c2 = arith.constant 2 : index
    %c0_7 = arith.constant 0 : index
    %c0_8 = arith.constant 0 : index
    %8 = vector.load %arg2[%c2, %c0_7, %c0_8] : memref<5x256x768xbf16, #tpu.memory_space<vmem>>, vector<1x256x768xbf16>
    %9 = vector.shape_cast %8 : vector<1x256x768xbf16> to vector<256x768xbf16>
    %cst_9 = arith.constant dense<0.000000e+00> : vector<16x768xf32>
    %10 = tpu.matmul %0, %9, %cst_9 {dimension_numbers = #tpu.dot_dimension_numbers<[1], [0], [0], [1], [0, 0, 1, 1], [], []>} : vector<16x256xbf16>, vector<256x768xbf16>, vector<16x768xf32> -> vector<16x768xf32>
    %11 = arith.maximumf %7, %10 : vector<16x768xf32>
    %c3 = arith.constant 3 : index
    %c0_10 = arith.constant 0 : index
    %c0_11 = arith.constant 0 : index
    %12 = vector.load %arg2[%c3, %c0_10, %c0_11] : memref<5x256x768xbf16, #tpu.memory_space<vmem>>, vector<1x256x768xbf16>
    %13 = vector.shape_cast %12 : vector<1x256x768xbf16> to vector<256x768xbf16>
    %cst_12 = arith.constant dense<0.000000e+00> : vector<16x768xf32>
    %14 = tpu.matmul %0, %13, %cst_12 {dimension_numbers = #tpu.dot_dimension_numbers<[1], [0], [0], [1], [0, 0, 1, 1], [], []>} : vector<16x256xbf16>, vector<256x768xbf16>, vector<16x768xf32> -> vector<16x768xf32>
    %15 = arith.maximumf %11, %14 : vector<16x768xf32>
    %c4 = arith.constant 4 : index
    %c0_13 = arith.constant 0 : index
    %c0_14 = arith.constant 0 : index
    %16 = vector.load %arg2[%c4, %c0_13, %c0_14] : memref<5x256x768xbf16, #tpu.memory_space<vmem>>, vector<1x256x768xbf16>
    %17 = vector.shape_cast %16 : vector<1x256x768xbf16> to vector<256x768xbf16>
    %cst_15 = arith.constant dense<0.000000e+00> : vector<16x768xf32>
    %18 = tpu.matmul %0, %17, %cst_15 {dimension_numbers = #tpu.dot_dimension_numbers<[1], [0], [0], [1], [0, 0, 1, 1], [], []>} : vector<16x256xbf16>, vector<256x768xbf16>, vector<16x768xf32> -> vector<16x768xf32>
    %19 = arith.maximumf %15, %18 : vector<16x768xf32>
    %c0_16 = arith.constant 0 : index
    %c0_17 = arith.constant 0 : index
    %20 = vector.load %arg3[%c0_16, %c0_17] : memref<1x768xf32, #tpu.memory_space<vmem>>, vector<1x768xf32>
    %21 = vector.broadcast %20 : vector<1x768xf32> to vector<16x768xf32>
    %22 = arith.addf %19, %21 : vector<16x768xf32>
    %23 = arith.truncf %22 : vector<16x768xf32> to vector<16x768xbf16>
    %24 = math.tanh %23 : vector<16x768xbf16>
    %c0_18 = arith.constant 0 : index
    %c0_19 = arith.constant 0 : index
    %25 = vector.load %arg4[%c0_18, %c0_19] : memref<768x128xbf16, #tpu.memory_space<vmem>>, vector<768x128xbf16>
    %cst_20 = arith.constant dense<0.000000e+00> : vector<16x128xf32>
    %26 = tpu.matmul %24, %25, %cst_20 {dimension_numbers = #tpu.dot_dimension_numbers<[1], [0], [0], [1], [0, 0, 1, 1], [], []>} : vector<16x768xbf16>, vector<768x128xbf16>, vector<16x128xf32> -> vector<16x128xf32>
    %c0_21 = arith.constant 0 : index
    %c0_22 = arith.constant 0 : index
    %27 = vector.load %arg5[%c0_21, %c0_22] : memref<1x128xf32, #tpu.memory_space<vmem>>, vector<1x128xf32>
    %28 = vector.broadcast %27 : vector<1x128xf32> to vector<16x128xf32>
    %29 = arith.addf %26, %28 : vector<16x128xf32>
    %30 = math.tanh %29 : vector<16x128xf32>
    %31 = arith.truncf %30 : vector<16x128xf32> to vector<16x128xbf16>
    %c0_23 = arith.constant 0 : index
    %c0_24 = arith.constant 0 : index
    %32 = vector.load %arg6[%c0_23, %c0_24] : memref<128x128xbf16, #tpu.memory_space<vmem>>, vector<128x128xbf16>
    %cst_25 = arith.constant dense<0.000000e+00> : vector<16x128xf32>
    %33 = tpu.matmul %31, %32, %cst_25 {dimension_numbers = #tpu.dot_dimension_numbers<[1], [0], [0], [1], [0, 0, 1, 1], [], []>} : vector<16x128xbf16>, vector<128x128xbf16>, vector<16x128xf32> -> vector<16x128xf32>
    %c0_26 = arith.constant 0 : index
    %c0_27 = arith.constant 0 : index
    %34 = vector.load %arg7[%c0_26, %c0_27] : memref<1x128xf32, #tpu.memory_space<vmem>>, vector<1x128xf32>
    %35 = vector.broadcast %34 : vector<1x128xf32> to vector<16x128xf32>
    %36 = arith.addf %33, %35 : vector<16x128xf32>
    %37 = math.tanh %36 : vector<16x128xf32>
    %38 = arith.truncf %37 : vector<16x128xf32> to vector<16x128xbf16>
    %c0_28 = arith.constant 0 : index
    %c0_29 = arith.constant 0 : index
    %39 = vector.load %arg8[%c0_28, %c0_29] : memref<16x128xbf16, #tpu.memory_space<vmem>>, vector<16x128xbf16>
    tpu.vector_store %arg8[%c0_28, %c0_29], %38 {strides = array<i32>} : memref<16x128xbf16, #tpu.memory_space<vmem>>, vector<16x128xbf16>,
    return
  }
  func.func @transform_0(%arg0: i32) -> (i32, i32) {
    %c0_i32 = arith.constant 0 : i32
    %c0_i32_0 = arith.constant 0 : i32
    return %arg0, %c0_i32 : i32, i32
  }
  func.func @transform_1(%arg0: i32) -> (i32, i32, i32) {
    %c0_i32 = arith.constant 0 : i32
    %c0_i32_0 = arith.constant 0 : i32
    %c0_i32_1 = arith.constant 0 : i32
    %c0_i32_2 = arith.constant 0 : i32
    return %c0_i32, %c0_i32_0, %c0_i32_1 : i32, i32, i32
  }
  func.func @transform_2(%arg0: i32) -> (i32, i32) {
    %c0_i32 = arith.constant 0 : i32
    %c0_i32_0 = arith.constant 0 : i32
    %c0_i32_1 = arith.constant 0 : i32
    return %c0_i32, %c0_i32_0 : i32, i32
  }
  func.func @transform_3(%arg0: i32) -> (i32, i32) {
    %c0_i32 = arith.constant 0 : i32
    %c0_i32_0 = arith.constant 0 : i32
    %c0_i32_1 = arith.constant 0 : i32
    return %c0_i32, %c0_i32_0 : i32, i32
  }
  func.func @transform_4(%arg0: i32) -> (i32, i32) {
    %c0_i32 = arith.constant 0 : i32
    %c0_i32_0 = arith.constant 0 : i32
    %c0_i32_1 = arith.constant 0 : i32
    return %c0_i32, %c0_i32_0 : i32, i32
  }
  func.func @transform_5(%arg0: i32) -> (i32, i32) {
    %c0_i32 = arith.constant 0 : i32
    %c0_i32_0 = arith.constant 0 : i32
    %c0_i32_1 = arith.constant 0 : i32
    return %c0_i32, %c0_i32_0 : i32, i32
  }
  func.func @transform_6(%arg0: i32) -> (i32, i32) {
    %c0_i32 = arith.constant 0 : i32
    %c0_i32_0 = arith.constant 0 : i32
    %c0_i32_1 = arith.constant 0 : i32
    return %c0_i32, %c0_i32_0 : i32, i32
  }
  func.func @transform_7(%arg0: i32) -> (i32, i32) {
    %c0_i32 = arith.constant 0 : i32
    %c0_i32_0 = arith.constant 0 : i32
    return %arg0, %c0_i32 : i32, i32
  }
}

</mosaic_0001>

<bundles_post_ra>
// kernel: tpu_custom_call.1
= control target key start
LH: loop header
LB: loop body
LE: loop exit
PB: predicated region body
PF: predicated region fallthrough
CT: control target
= control target key end

     0   :  { %12 = vsyncpa [#allocation3], 0  ;;  %s6368_s0 = inlined_call_operand.hbm [shape: bf16[16,256], index: 0, kind: input, shape index: {}]   ;;  %s6369_s1 = inlined_call_operand.hbm [shape: bf16[5,256,768], index: 1, kind: input, shape index: {}]   ;;  %s6370_s2 = inlined_call_operand.hbm [shape: f32[1,768], index: 2, kind: input, shape index: {}]   ;;  %s6371_s3 = inlined_call_operand.hbm [shape: bf16[768,128], index: 3, kind: input, shape index: {}]   ;;  %s6372_s4 = inlined_call_operand.hbm [shape: f32[1,128], index: 4, kind: input, shape index: {}]   ;;  %s6373_s5 = inlined_call_operand.hbm [shape: bf16[128,128], index: 5, kind: input, shape index: {}]   ;;  %s6374_s6 = inlined_call_operand.hbm [shape: f32[1,128], index: 6, kind: input, shape index: {}]   ;;  %s6375_s7 = inlined_call_operand.hbm [shape: bf16[16,128], index: 7, kind: output, shape index: {}]  }
   0x1   :  { %13 = vsyncpa [#allocation6], 0 }
   0x2   :  { %14 = vsyncpa [#allocation9], 0 }
   0x3   :  { %15 = vsyncpa [#allocation12], 0 }
   0x4   :  { %16 = vsyncpa [#allocation4], 0  ;;  %s6056_s24 = smov [#allocation5]  }
   0x5   :  { %s34_s25 = sshll.u32 %s6056_s24, 4  ;;  %s35_s25 = int_to_ptr.vmem [resolvable:$true] %s34_s25 }
   0x6   :  { %s5894_s26 = scalar_lea.vmem %s35_s25, 61440  ;;  %p5899_p1 = scmp.lt.s32.totalorder %s35_s25, %s35_s25 }
   0x7   :  { %p5895_p0 = scmp.ne.s32.totalorder %s35_s25, %s5894_s26  ;;  %p5900_p2 = scmp.lt.s32.totalorder %s5894_s26, %s5894_s26 }
   0x9   :  { %p5901_p3 = por %p5900_p2, %p5899_p1 }
   0xb   :  { %p5902_p4 = pnand %p5901_p3, %p5895_p0 }
   0xd   :  { %5905 = shalt.err (!%p5902_p4)
}
   0xe   :  { %s6057_s27 = smov 384   ;;  %s6058_s28 = smov 24  }
   0xf   :  { %40 = dma.hbm_to_vmem [thread:$0]  %s6369_s1, 61440, %s35_s25, [#allocation6], %s6057_s27, %s6057_s27, %s6058_s28  }
  0x10   :  { %s6059_s8 = smov [#allocation8]  }
  0x11   :  { %s56_s9 = sshll.u32 %s6059_s8, 4  ;;  %s57_s9 = int_to_ptr.vmem [resolvable:$true] %s56_s9 }
  0x12   :  { %s5914_s10 = scalar_lea.vmem %s57_s9, 6144  ;;  %p5919_p6 = scmp.lt.s32.totalorder %s57_s9, %s57_s9 }
  0x13   :  { %p5915_p5 = scmp.ne.s32.totalorder %s57_s9, %s5914_s10  ;;  %p5920_p7 = scmp.lt.s32.totalorder %s5914_s10, %s5914_s10 }
  0x15   :  { %p5921_p8 = por %p5920_p7, %p5919_p6 }
  0x17   :  { %p5922_p9 = pnand %p5921_p8, %p5915_p5 }
  0x19   :  { %5925 = shalt.err (!%p5922_p9)
}
  0x1a   :  { %s6060_s11 = smov 64   ;;  %s6061_s12 = smov 4  }
  0x1b   :  { %62 = dma.hbm_to_vmem [thread:$0]  %s6371_s3, 6144, %s57_s9, [#allocation9], %s6060_s11, %s6060_s11, %s6061_s12  }
  0x1c   :  { %s6062_s1 = smov [#allocation11]   ;;  %s6063_s16 = smov [#allocation2]  }
  0x1d   :  { %s78_s15 = sshll.u32 %s6062_s1, 4  ;;  %s22_s17 = sshll.u32 %s6063_s16, 4  ;;  %s79_s15 = int_to_ptr.vmem [resolvable:$true] %s78_s15  ;;  %s23_s17 = int_to_ptr.vmem [resolvable:$true] %s22_s17 }
  0x1e   :  { %s5934_s18 = scalar_lea.vmem %s79_s15, 1024  ;;  %p5939_p11 = scmp.lt.s32.totalorder %s79_s15, %s79_s15 }
  0x1f   :  { %p5935_p10 = scmp.ne.s32.totalorder %s79_s15, %s5934_s18  ;;  %p5940_p12 = scmp.lt.s32.totalorder %s5934_s18, %s5934_s18 }
  0x21   :  { %p5941_p13 = por %p5940_p12, %p5939_p11 }
  0x23   :  { %p5942_p0 = pnand %p5941_p13, %p5935_p10 }
  0x25   :  { %5945 = shalt.err (!%p5942_p0)
}
  0x26   :  { %84 = dma.hbm_to_vmem [thread:$0]  %s6373_s5, 1024, %s79_s15, [#allocation12], %s6060_s11, %s6060_s11, %s6061_s12  }
  0x27   :  { %s5954_s3 = scalar_lea.vmem %s23_s17, 256  ;;  %p5959_p2 = scmp.lt.s32.totalorder %s23_s17, %s23_s17 }
  0x28   :  { %p5955_p1 = scmp.ne.s32.totalorder %s23_s17, %s5954_s3  ;;  %p5960_p3 = scmp.lt.s32.totalorder %s5954_s3, %s5954_s3 }
  0x2a   :  { %p5961_p4 = por %p5960_p3, %p5959_p2 }
  0x2c   :  { %p5962_p5 = pnand %p5961_p4, %p5955_p1 }
  0x2e   :  { %5965 = shalt.err (!%p5962_p5)
}
  0x2f   :  { %s6064_s21 = smov 128   ;;  %s6065_s22 = smov 8  }
  0x30   :  { %28 = dma.hbm_to_vmem [thread:$0]  %s6368_s0, 256, %s23_s17, [#allocation3], %s6064_s21, %s6064_s21, %s6065_s22  }
  0x31   :  { %s6066_s25 = smov [#allocation7]   ;;  %s6067_s27 = smov [#allocation10]  }
  0x32   :  { %s47_s26 = sshll.u32 %s6066_s25, 4  ;;  %s69_s28 = sshll.u32 %s6067_s27, 4  ;;  %s48_s26 = int_to_ptr.vmem [resolvable:$true] %s47_s26  ;;  %s70_s28 = int_to_ptr.vmem [resolvable:$true] %s69_s28 }
  0x33   :  { %s5974_s5 = scalar_lea.vmem %s48_s26, 96  ;;  %p5979_p7 = scmp.lt.s32.totalorder %s48_s26, %s48_s26 }
  0x34   :  { %p5975_p6 = scmp.ne.s32.totalorder %s48_s26, %s5974_s5  ;;  %p5980_p8 = scmp.lt.s32.totalorder %s5974_s5, %s5974_s5 }
  0x36   :  { %p5981_p9 = por %p5980_p8, %p5979_p7 }
  0x38   :  { %p5982_p10 = pnand %p5981_p9, %p5975_p6 }
  0x3a   :  { %5985 = shalt.err (!%p5982_p10)
}
  0x3b   :  { %50 = dma.hbm_to_vmem [thread:$0]  %s6370_s2, 96, %s48_s26, [#allocation6]  }
  0x3c   :  { %s5994_s8 = scalar_lea.vmem %s70_s28, 16  ;;  %s5998_s0 = scalar_lea.vmem %s70_s28, 32 }
  0x3d   :  { %p5995_p11 = scmp.ne.s32.totalorder %s70_s28, %s5994_s8  ;;  %p5999_p12 = scmp.lt.s32.totalorder %s70_s28, %s70_s28 }
  0x3e   :  { %p6000_p13 = scmp.lt.s32.totalorder %s5998_s0, %s5994_s8 }
  0x40   :  { %p6001_p0 = por %p6000_p13, %p5999_p12 }
  0x42   :  { %p6002_p1 = pnand %p6001_p0, %p5995_p11 }
  0x44   :  { %6005 = shalt.err (!%p6002_p1)
}
  0x45   :  { %72 = dma.hbm_to_vmem [thread:$0]  %s6372_s4, 16, %s70_s28, [#allocation9]  }
  0x46   :  { %s6068_s13 = smov [#allocation13]  }
  0x47   :  { %s91_s14 = sshll.u32 %s6068_s13, 4  ;;  %s92_s14 = int_to_ptr.vmem [resolvable:$true] %s91_s14 }
  0x48   :  { %s6014_s1 = scalar_lea.vmem %s92_s14, 16  ;;  %s6018_s15 = scalar_lea.vmem %s92_s14, 32 }
  0x49   :  { %p6015_p2 = scmp.ne.s32.totalorder %s92_s14, %s6014_s1  ;;  %p6019_p3 = scmp.lt.s32.totalorder %s92_s14, %s92_s14 }
  0x4a   :  { %p6020_p4 = scmp.lt.s32.totalorder %s6018_s15, %s6014_s1 }
  0x4c   :  { %p6021_p5 = por %p6020_p4, %p6019_p3 }
  0x4e   :  { %p6022_p6 = pnand %p6021_p5, %p6015_p2 }
  0x50   :  { %6025 = shalt.err (!%p6022_p6)
}
  0x51   :  { %94 = dma.hbm_to_vmem [thread:$0]  %s6374_s6, 16, %s92_s14, [#allocation12]  }
  0x52   :  { %6046 = dma.done.wait [#allocation3], 256  }
  0x53   :  { %6047 = vsyncadd [#allocation3], 4294967040 }
  0x54   :  { %6048 = dma.done.wait [#allocation6], 61536  }
  0x55   :  { %6049 = vsyncadd [#allocation6], 4294905760 }
  0x56   :  { %6050 = dma.done.wait [#allocation9], 6160  }
  0x57   :  { %6051 = vsyncadd [#allocation9], 4294961136 }
  0x58   :  { %6052 = dma.done.wait [#allocation12], 1040  }
  0x59   :  { %6053 = vsyncadd [#allocation12], 4294966256  ;;  %v5083_v0 = vld [vmem:[#allocation5 + $0x154] ss:$24 sps:$4 sm:$0xff]   ;;  %v5087_v2 = vld [vmem:[#allocation5 + $0x150] ss:$24 sps:$4 sm:$0xff]  }
  0x5a   :  { %v5085_v1 = vld [vmem:[#allocation5 + $0x15c] ss:$24 sps:$4 sm:$0xff]   ;;  %705 = vmatprep.subr.bf16.mxu0 %v5083_v0  ;;  %v5088_v3 = vld [vmem:[#allocation5 + $0x158] ss:$24 sps:$4 sm:$0xff]   ;;  %v5091_v5 = vld [vmem:[#allocation5 + $0x12c] ss:$24 sps:$4 sm:$0xff]  }
  0x5b   :  { %748 = vmatprep.subr.bf16.mxu1 %v5085_v1  ;;  %v5089_v4 = vld [vmem:[#allocation5 + $0x124] ss:$24 sps:$4 sm:$0xff]   ;;  %706 = vmatpush1.bf16.msra.mxu0 %v5087_v2  ;;  %v5093_v6 = vld [vmem:[#allocation5 + $0x120] ss:$24 sps:$4 sm:$0xff]   ;;  %v5095_v8 = vld [vmem:[#allocation5 + $0xf4] ss:$24 sps:$4 sm:$0xff]  }
  0x5c   :  { %749 = vmatpush1.bf16.msra.mxu1 %v5088_v3  ;;  %707 = vmatprep.subr.bf16.mxu0 %v5089_v4  ;;  %v5094_v7 = vld [vmem:[#allocation5 + $0x128] ss:$24 sps:$4 sm:$0xff]   ;;  %v5097_v9 = vld [vmem:[#allocation5 + $0xfc] ss:$24 sps:$4 sm:$0xff]   ;;  %v5100_v11 = vld [vmem:[#allocation5 + $0xf8] ss:$24 sps:$4 sm:$0xff]  }
  0x5d   :  { %750 = vmatprep.subr.bf16.mxu1 %v5091_v5  ;;  %v5099_v10 = vld [vmem:[#allocation5 + $0xf0] ss:$24 sps:$4 sm:$0xff]   ;;  %v5101_v12 = vld [vmem:[#allocation5 + $0xc4] ss:$24 sps:$4 sm:$0xff]   ;;  %v5105_v14 = vld [vmem:[#allocation5 + $0xc0] ss:$24 sps:$4 sm:$0xff]  }
  0x5e   :  { %v5103_v13 = vld [vmem:[#allocation5 + $0xcc] ss:$24 sps:$4 sm:$0xff]   ;;  %v5106_v15 = vld [vmem:[#allocation5 + $0xc8] ss:$24 sps:$4 sm:$0xff]   ;;  %v5109_v17 = vld [vmem:[#allocation5 + $0x9c] ss:$24 sps:$4 sm:$0xff]  }
  0x5f   :  { %708 = vmatpush1.bf16.msra.mxu0 %v5093_v6  ;;  %v5107_v16 = vld [vmem:[#allocation5 + $0x94] ss:$24 sps:$4 sm:$0xff]   ;;  %v5111_v18 = vld [vmem:[#allocation5 + $0x90] ss:$24 sps:$4 sm:$0xff]   ;;  %v5113_v20 = vld [vmem:[#allocation5 + $0x64] ss:$24 sps:$4 sm:$0xff]  }
  0x60   :  { %751 = vmatpush1.bf16.msra.mxu1 %v5094_v7  ;;  %709 = vmatprep.subr.bf16.mxu0 %v5095_v8  ;;  %v5112_v19 = vld [vmem:[#allocation5 + $0x98] ss:$24 sps:$4 sm:$0xff]   ;;  %v5115_v21 = vld [vmem:[#allocation5 + $0x6c] ss:$24 sps:$4 sm:$0xff]   ;;  %v5118_v23 = vld [vmem:[#allocation5 + $0x68] ss:$24 sps:$4 sm:$0xff]  }
  0x61   :  { %752 = vmatprep.subr.bf16.mxu1 %v5097_v9  ;;  %v5117_v22 = vld [vmem:[#allocation5 + $0x60] ss:$24 sps:$4 sm:$0xff]   ;;  %v5119_v24 = vld [vmem:[#allocation5 + $0x34] ss:$24 sps:$4 sm:$0xff]   ;;  %v5123_v26 = vld [vmem:[#allocation5 + $0x30] ss:$24 sps:$4 sm:$0xff]  }
  0x62   :  { %v5121_v25 = vld [vmem:[#allocation5 + $0x3c] ss:$24 sps:$4 sm:$0xff]   ;;  %v5124_v27 = vld [vmem:[#allocation5 + $0x38] ss:$24 sps:$4 sm:$0xff]   ;;  %v5127_v29 = vld [vmem:[#allocation5 + $0xc] ss:$24 sps:$4 sm:$0xff]  }
  0x63   :  { %710 = vmatpush1.bf16.msra.mxu0 %v5099_v10  ;;  %v5125_v28 = vld [vmem:[#allocation5 + $0x4] ss:$24 sps:$4 sm:$0xff]   ;;  %v5129_v30 = vld [vmem:[#allocation5] ss:$24 sps:$4 sm:$0xff]   ;;  %v5131_v32 = vld [vmem:[#allocation5 + $0x2d4] ss:$24 sps:$4 sm:$0xff]  }
  0x64   :  { %753 = vmatpush1.bf16.msra.mxu1 %v5100_v11  ;;  %711 = vmatprep.subr.bf16.mxu0 %v5101_v12  ;;  %v5130_v31 = vld [vmem:[#allocation5 + $0x8] ss:$24 sps:$4 sm:$0xff]   ;;  %v5133_v33 = vld [vmem:[#allocation5 + $0x2dc] ss:$24 sps:$4 sm:$0xff]   ;;  %v5136_v35 = vld [vmem:[#allocation5 + $0x2d8] ss:$24 sps:$4 sm:$0xff]  }
  0x65   :  { %754 = vmatprep.subr.bf16.mxu1 %v5103_v13  ;;  %v5135_v34 = vld [vmem:[#allocation5 + $0x2d0] ss:$24 sps:$4 sm:$0xff]   ;;  %v5137_v36 = vld [vmem:[#allocation5 + $0x2a4] ss:$24 sps:$4 sm:$0xff]   ;;  %v5141_v38 = vld [vmem:[#allocation5 + $0x2a0] ss:$24 sps:$4 sm:$0xff]  }
  0x66   :  { %v5139_v37 = vld [vmem:[#allocation5 + $0x2ac] ss:$24 sps:$4 sm:$0xff]   ;;  %v5142_v39 = vld [vmem:[#allocation5 + $0x2a8] ss:$24 sps:$4 sm:$0xff]   ;;  %v5145_v41 = vld [vmem:[#allocation5 + $0x27c] ss:$24 sps:$4 sm:$0xff]  }
  0x67   :  { %712 = vmatpush1.bf16.msra.mxu0 %v5105_v14  ;;  %v5143_v40 = vld [vmem:[#allocation5 + $0x274] ss:$24 sps:$4 sm:$0xff]   ;;  %v5147_v42 = vld [vmem:[#allocation5 + $0x270] ss:$24 sps:$4 sm:$0xff]   ;;  %v5149_v44 = vld [vmem:[#allocation5 + $0x244] ss:$24 sps:$4 sm:$0xff]  }
  0x68   :  { %755 = vmatpush1.bf16.msra.mxu1 %v5106_v15  ;;  %713 = vmatprep.subr.bf16.mxu0 %v5107_v16  ;;  %v5148_v43 = vld [vmem:[#allocation5 + $0x278] ss:$24 sps:$4 sm:$0xff]   ;;  %v5151_v45 = vld [vmem:[#allocation5 + $0x24c] ss:$24 sps:$4 sm:$0xff]   ;;  %v5154_v47 = vld [vmem:[#allocation5 + $0x248] ss:$24 sps:$4 sm:$0xff]  }
  0x69   :  { %756 = vmatprep.subr.bf16.mxu1 %v5109_v17  ;;  %v5153_v46 = vld [vmem:[#allocation5 + $0x240] ss:$24 sps:$4 sm:$0xff]   ;;  %v6139_v48 = vld [vmem:[#allocation2 + $0x4] ss:$8 sps:$4 sm:$0xff]   ;;  %v5159_v51 = vld [vmem:[#allocation5 + $0x210] ss:$24 sps:$4 sm:$0xff]  }
  0x6a   :  { %v5155_v49 = vld [vmem:[#allocation5 + $0x214] ss:$24 sps:$4 sm:$0xff]   ;;  %737 = vmatprep.mubr.bf16.mxu0 %v6139_v48  ;;  %780 = vmatprep.mubr.bf16.mxu1 %v6139_v48  ;;  %v5160_v52 = vld [vmem:[#allocation5 + $0x218] ss:$24 sps:$4 sm:$0xff]   ;;  %v5161_v53 = vld [vmem:[#allocation5 + $0x1e4] ss:$24 sps:$4 sm:$0xff]  }
  0x6b   :  { %714 = vmatpush1.bf16.msra.mxu0 %v5111_v18  ;;  %v5157_v50 = vld [vmem:[#allocation5 + $0x21c] ss:$24 sps:$4 sm:$0xff]   ;;  %v5163_v54 = vld [vmem:[#allocation5 + $0x1ec] ss:$24 sps:$4 sm:$0xff]   ;;  %v5165_v55 = vld [vmem:[#allocation5 + $0x1e0] ss:$24 sps:$4 sm:$0xff]  }
  0x6c   :  { %757 = vmatpush1.bf16.msra.mxu1 %v5112_v19  ;;  %715 = vmatprep.subr.bf16.mxu0 %v5113_v20  ;;  %v5166_v56 = vld [vmem:[#allocation5 + $0x1e8] ss:$24 sps:$4 sm:$0xff]   ;;  %v5167_v57 = vld [vmem:[#allocation5 + $0x1b4] ss:$24 sps:$4 sm:$0xff]   ;;  %v5172_v60 = vld [vmem:[#allocation5 + $0x1b8] ss:$24 sps:$4 sm:$0xff]  }
  0x6d   :  { %758 = vmatprep.subr.bf16.mxu1 %v5115_v21  ;;  %v5169_v58 = vld [vmem:[#allocation5 + $0x1bc] ss:$24 sps:$4 sm:$0xff]   ;;  %v5171_v59 = vld [vmem:[#allocation5 + $0x1b0] ss:$24 sps:$4 sm:$0xff]   ;;  %v5175_v62 = vld [vmem:[#allocation5 + $0x18c] ss:$24 sps:$4 sm:$0xff]  }
  0x6e   :  { %v5173_v61 = vld [vmem:[#allocation5 + $0x184] ss:$24 sps:$4 sm:$0xff]   ;;  %v5177_v63 = vld [vmem:[#allocation5 + $0x180] ss:$24 sps:$4 sm:$0xff]   ;;  %v5187_v2 = vld [vmem:[#allocation5 + $0x454] ss:$24 sps:$4 sm:$0xff]  }
  0x6f   :  { %716 = vmatpush1.bf16.msra.mxu0 %v5117_v22  ;;  %v5178_v0 = vld [vmem:[#allocation5 + $0x188] ss:$24 sps:$4 sm:$0xff]   ;;  %v5184_v1 = vld [vmem:[#allocation5 + $0x164] ss:$24 sps:$4 sm:$0xff]   ;;  %v6143_v3 = vld [vmem:[#allocation2] ss:$8 sps:$4 sm:$0xff]  }
  0x70   :  { %759 = vmatpush1.bf16.msra.mxu1 %v5118_v23  ;;  %717 = vmatprep.subr.bf16.mxu0 %v5119_v24  ;;  %v5182_v4 = vld [vmem:[#allocation5 + $0x160] ss:$24 sps:$4 sm:$0xff]   ;;  %v5185_v5 = vld [vmem:[#allocation5 + $0x450] ss:$24 sps:$4 sm:$0xff]   ;;  %v5190_v6 = vld [vmem:[#allocation5 + $0x134] ss:$24 sps:$4 sm:$0xff]  }
  0x71   :  { %760 = vmatprep.subr.bf16.mxu1 %v5121_v25  ;;  %v5193_v7 = vld [vmem:[#allocation5 + $0x424] ss:$24 sps:$4 sm:$0xff]   ;;  %v5188_v8 = vld [vmem:[#allocation5 + $0x130] ss:$24 sps:$4 sm:$0xff]   ;;  %v5191_v9 = vld [vmem:[#allocation5 + $0x420] ss:$24 sps:$4 sm:$0xff]  }
  0x72   :  { %v5196_v10 = vld [vmem:[#allocation5 + $0x104] ss:$24 sps:$4 sm:$0xff]   ;;  %v5199_v11 = vld [vmem:[#allocation5 + $0x3f4] ss:$24 sps:$4 sm:$0xff]   ;;  %v5194_v12 = vld [vmem:[#allocation5 + $0x100] ss:$24 sps:$4 sm:$0xff]  }
  0x73   :  { %718 = vmatpush1.bf16.msra.mxu0 %v5123_v26  ;;  %v5197_v13 = vld [vmem:[#allocation5 + $0x3f0] ss:$24 sps:$4 sm:$0xff]   ;;  %v5202_v14 = vld [vmem:[#allocation5 + $0xd4] ss:$24 sps:$4 sm:$0xff]   ;;  %v5205_v15 = vld [vmem:[#allocation5 + $0x3c4] ss:$24 sps:$4 sm:$0xff]  }
  0x74   :  { %761 = vmatpush1.bf16.msra.mxu1 %v5124_v27  ;;  %719 = vmatprep.subr.bf16.mxu0 %v5125_v28  ;;  %v5200_v16 = vld [vmem:[#allocation5 + $0xd0] ss:$24 sps:$4 sm:$0xff]   ;;  %v5203_v17 = vld [vmem:[#allocation5 + $0x3c0] ss:$24 sps:$4 sm:$0xff]   ;;  %v5208_v18 = vld [vmem:[#allocation5 + $0xa4] ss:$24 sps:$4 sm:$0xff]  }
  0x75   :  { %762 = vmatprep.subr.bf16.mxu1 %v5127_v29  ;;  %v5211_v19 = vld [vmem:[#allocation5 + $0x394] ss:$24 sps:$4 sm:$0xff]   ;;  %v5206_v20 = vld [vmem:[#allocation5 + $0xa0] ss:$24 sps:$4 sm:$0xff]   ;;  %v5209_v21 = vld [vmem:[#allocation5 + $0x390] ss:$24 sps:$4 sm:$0xff]  }
  0x76   :  { %v5214_v22 = vld [vmem:[#allocation5 + $0x74] ss:$24 sps:$4 sm:$0xff]   ;;  %v5217_v23 = vld [vmem:[#allocation5 + $0x364] ss:$24 sps:$4 sm:$0xff]   ;;  %v5212_v24 = vld [vmem:[#allocation5 + $0x70] ss:$24 sps:$4 sm:$0xff]  }
  0x77   :  { %720 = vmatpush1.bf16.msra.mxu0 %v5129_v30  ;;  %v5215_v25 = vld [vmem:[#allocation5 + $0x360] ss:$24 sps:$4 sm:$0xff]   ;;  %v5220_v26 = vld [vmem:[#allocation5 + $0x44] ss:$24 sps:$4 sm:$0xff]   ;;  %v5223_v27 = vld [vmem:[#allocation5 + $0x334] ss:$24 sps:$4 sm:$0xff]  }
  0x78   :  { %763 = vmatpush1.bf16.msra.mxu1 %v5130_v31  ;;  %721 = vmatprep.subr.bf16.mxu0 %v5131_v32  ;;  %v5218_v28 = vld [vmem:[#allocation5 + $0x40] ss:$24 sps:$4 sm:$0xff]   ;;  %v5221_v29 = vld [vmem:[#allocation5 + $0x330] ss:$24 sps:$4 sm:$0xff]   ;;  %v5226_v30 = vld [vmem:[#allocation5 + $0x14] ss:$24 sps:$4 sm:$0xff]  }
  0x79   :  { %764 = vmatprep.subr.bf16.mxu1 %v5133_v33  ;;  %v5229_v31 = vld [vmem:[#allocation5 + $0x304] ss:$24 sps:$4 sm:$0xff]   ;;  %v5224_v32 = vld [vmem:[#allocation5 + $0x10] ss:$24 sps:$4 sm:$0xff]   ;;  %v5227_v33 = vld [vmem:[#allocation5 + $0x300] ss:$24 sps:$4 sm:$0xff]  }
  0x7a   :  { %vm6070_vm0 = vmmov 0   ;;  %s6071_s4 = smov [#allocation14]  }
  0x7b   :  { %722 = vmatpush2.bf16.msra.mxu0 %v5135_v34  ;;  %v5232_v34 = vld [vmem:[#allocation5 + $0x2e4] ss:$24 sps:$4 sm:$0xff]   ;;  %s4408_s6 = sshll.u32 %s6071_s4, 4  ;;  %s4409_s6 = int_to_ptr.vmem [resolvable:$true] %s4408_s6 }
  0x7c   :  { %765 = vmatpush2.bf16.msra.mxu1 %v5136_v35  ;;  %723 = vmatprep.subr.bf16.mxu0 %v5137_v36  ;;  %v5235_v35 = vld [vmem:[#allocation5 + $0x5d4] ss:$24 sps:$4 sm:$0xff]   ;;  %v5230_v36 = vld [vmem:[#allocation5 + $0x2e0] ss:$24 sps:$4 sm:$0xff]   ;;  %s6026_s17 = scalar_lea.vmem %s4409_s6, 128  ;;  %p6031_p8 = scmp.lt.s32.totalorder %s4409_s6, %s4409_s6 }
  0x7d   :  { %766 = vmatprep.subr.bf16.mxu1 %v5139_v37  ;;  %v5233_v37 = vld [vmem:[#allocation5 + $0x5d0] ss:$24 sps:$4 sm:$0xff]   ;;  %p6027_p7 = scmp.ne.s32.totalorder %s4409_s6, %s6026_s17  ;;  %p6032_p9 = scmp.lt.s32.totalorder %s6026_s17, %s6026_s17 }
  0x7f   :  { %724 = vmatpush2.bf16.msra.mxu0 %v5141_v38  ;;  %v5238_v38 = vld [vmem:[#allocation5 + $0x2b4] ss:$24 sps:$4 sm:$0xff]   ;;  %p6033_p10 = por %p6032_p9, %p6031_p8 }
  0x80   :  { %767 = vmatpush2.bf16.msra.mxu1 %v5142_v39  ;;  %725 = vmatprep.subr.bf16.mxu0 %v5143_v40  ;;  %v5241_v39 = vld [vmem:[#allocation5 + $0x5a4] ss:$24 sps:$4 sm:$0xff]   ;;  %v5236_v40 = vld [vmem:[#allocation5 + $0x2b0] ss:$24 sps:$4 sm:$0xff]  }
  0x81   :  { %768 = vmatprep.subr.bf16.mxu1 %v5145_v41  ;;  %v5239_v41 = vld [vmem:[#allocation5 + $0x5a0] ss:$24 sps:$4 sm:$0xff]   ;;  %p6034_p11 = pnand %p6033_p10, %p6027_p7 }
  0x83   :  { %726 = vmatpush2.bf16.msra.mxu0 %v5147_v42  ;;  %v5244_v42 = vld [vmem:[#allocation5 + $0x284] ss:$24 sps:$4 sm:$0xff]  }
  0x84   :  { %769 = vmatpush2.bf16.msra.mxu1 %v5148_v43  ;;  %727 = vmatprep.subr.bf16.mxu0 %v5149_v44  ;;  %v5247_v43 = vld [vmem:[#allocation5 + $0x574] ss:$24 sps:$4 sm:$0xff]   ;;  %v5242_v44 = vld [vmem:[#allocation5 + $0x280] ss:$24 sps:$4 sm:$0xff]  }
  0x85   :  { %770 = vmatprep.subr.bf16.mxu1 %v5151_v45  ;;  %v5245_v45 = vld [vmem:[#allocation5 + $0x570] ss:$24 sps:$4 sm:$0xff]  }
  0x87   :  { %728 = vmatpush2.bf16.msra.mxu0 %v5153_v46  ;;  %v5250_v46 = vld [vmem:[#allocation5 + $0x254] ss:$24 sps:$4 sm:$0xff]  }
  0x88   :  { %771 = vmatpush2.bf16.msra.mxu1 %v5154_v47  ;;  %729 = vmatprep.subr.bf16.mxu0 %v5155_v49  ;;  %v5253_v47 = vld [vmem:[#allocation5 + $0x544] ss:$24 sps:$4 sm:$0xff]   ;;  %v5248_v49 = vld [vmem:[#allocation5 + $0x250] ss:$24 sps:$4 sm:$0xff]  }
  0x89   :  { %772 = vmatprep.subr.bf16.mxu1 %v5157_v50  ;;  %v5251_v50 = vld [vmem:[#allocation5 + $0x540] ss:$24 sps:$4 sm:$0xff]  }
  0x8b   :  { %730 = vmatpush2.bf16.msra.mxu0 %v5159_v51  ;;  %v5256_v51 = vld [vmem:[#allocation5 + $0x224] ss:$24 sps:$4 sm:$0xff]  }
  0x8c   :  { %773 = vmatpush2.bf16.msra.mxu1 %v5160_v52  ;;  %731 = vmatprep.subr.bf16.mxu0 %v5161_v53  ;;  %v5259_v52 = vld [vmem:[#allocation5 + $0x514] ss:$24 sps:$4 sm:$0xff]   ;;  %v5254_v53 = vld [vmem:[#allocation5 + $0x220] ss:$24 sps:$4 sm:$0xff]  }
  0x8d   :  { %774 = vmatprep.subr.bf16.mxu1 %v5163_v54  ;;  %v5257_v54 = vld [vmem:[#allocation5 + $0x510] ss:$24 sps:$4 sm:$0xff]  }
  0x8f   :  { %732 = vmatpush2.bf16.msra.mxu0 %v5165_v55  ;;  %v5262_v55 = vld [vmem:[#allocation5 + $0x1f4] ss:$24 sps:$4 sm:$0xff]  }
  0x90   :  { %775 = vmatpush2.bf16.msra.mxu1 %v5166_v56  ;;  %733 = vmatprep.subr.bf16.mxu0 %v5167_v57  ;;  %v5265_v56 = vld [vmem:[#allocation5 + $0x4e4] ss:$24 sps:$4 sm:$0xff]   ;;  %v5260_v57 = vld [vmem:[#allocation5 + $0x1f0] ss:$24 sps:$4 sm:$0xff]  }
  0x91   :  { %776 = vmatprep.subr.bf16.mxu1 %v5169_v58  ;;  %v5263_v58 = vld [vmem:[#allocation5 + $0x4e0] ss:$24 sps:$4 sm:$0xff]  }
  0x93   :  { %734 = vmatpush2.bf16.msra.mxu0 %v5171_v59  ;;  %v5268_v59 = vld [vmem:[#allocation5 + $0x1c4] ss:$24 sps:$4 sm:$0xff]  }
  0x94   :  { %777 = vmatpush2.bf16.msra.mxu1 %v5172_v60  ;;  %735 = vmatprep.subr.bf16.mxu0 %v5173_v61  ;;  %v5271_v60 = vld [vmem:[#allocation5 + $0x4b4] ss:$24 sps:$4 sm:$0xff]   ;;  %v5266_v61 = vld [vmem:[#allocation5 + $0x1c0] ss:$24 sps:$4 sm:$0xff]  }
  0x95   :  { %778 = vmatprep.subr.bf16.mxu1 %v5175_v62  ;;  %v5269_v62 = vld [vmem:[#allocation5 + $0x4b0] ss:$24 sps:$4 sm:$0xff]  }
  0x97   :  { %736 = vmatpush2.bf16.msra.mxu0 %v5177_v63  ;;  %v5274_v63 = vld [vmem:[#allocation5 + $0x194] ss:$24 sps:$4 sm:$0xff]  }
  0x98   :  { %779 = vmatpush2.bf16.msra.mxu1 %v5178_v0  ;;  %791 = vmatprep.subr.bf16.mxu0 %v5184_v1  ;;  %v5277_v0 = vld [vmem:[#allocation5 + $0x484] ss:$24 sps:$4 sm:$0xff]   ;;  %v5272_v1 = vld [vmem:[#allocation5 + $0x190] ss:$24 sps:$4 sm:$0xff]  }
  0x99   :  { %1411 = vmatprep.subr.bf16.mxu1 %v5187_v2  ;;  %v5275_v2 = vld [vmem:[#allocation5 + $0x480] ss:$24 sps:$4 sm:$0xff]  }
  0x9a   :  { %738 = vmatmul.mubr.bf16.vlgmr.msra.gmra.mxu0 %v6143_v3 }
  0x9b   :  { %781 = vmatmul.mubr.bf16.vlgmr.msra.gmra.mxu1 %v6143_v3  ;;  %792 = vmatpush1.bf16.msra.mxu0 %v5182_v4  ;;  %v5280_v4 = vld [vmem:[#allocation5 + $0x45c] ss:$24 sps:$4 sm:$0xff]  }
  0x9c   :  { %1412 = vmatpush1.bf16.msra.mxu1 %v5185_v5  ;;  %793 = vmatprep.subr.bf16.mxu0 %v5190_v6  ;;  %v5283_v5 = vld [vmem:[#allocation5 + $0x464] ss:$24 sps:$4 sm:$0xff]   ;;  %v5278_v6 = vld [vmem:[#allocation5 + $0x458] ss:$24 sps:$4 sm:$0xff]  }
  0x9d   :  { %1413 = vmatprep.subr.bf16.mxu1 %v5193_v7  ;;  %823 = vmatprep.mubr.bf16.mxu0 %v6139_v48  ;;  %v5281_v7 = vld [vmem:[#allocation5 + $0x460] ss:$24 sps:$4 sm:$0xff]  }
  0x9e   :  { %1443 = vmatprep.mubr.bf16.mxu1 %v6139_v48 }
  0x9f   :  { %794 = vmatpush1.bf16.msra.mxu0 %v5188_v8  ;;  %v5286_v8 = vld [vmem:[#allocation5 + $0x42c] ss:$24 sps:$4 sm:$0xff]  }
  0xa0   :  { %1414 = vmatpush1.bf16.msra.mxu1 %v5191_v9  ;;  %795 = vmatprep.subr.bf16.mxu0 %v5196_v10  ;;  %v5289_v9 = vld [vmem:[#allocation5 + $0x434] ss:$24 sps:$4 sm:$0xff]   ;;  %v5284_v10 = vld [vmem:[#allocation5 + $0x428] ss:$24 sps:$4 sm:$0xff]  }
  0xa1   :  { %1415 = vmatprep.subr.bf16.mxu1 %v5199_v11  ;;  %v5287_v11 = vld [vmem:[#allocation5 + $0x430] ss:$24 sps:$4 sm:$0xff]  }
  0xa3   :  { %796 = vmatpush1.bf16.msra.mxu0 %v5194_v12  ;;  %v5292_v12 = vld [vmem:[#allocation5 + $0x3fc] ss:$24 sps:$4 sm:$0xff]  }
  0xa4   :  { %1416 = vmatpush1.bf16.msra.mxu1 %v5197_v13  ;;  %797 = vmatprep.subr.bf16.mxu0 %v5202_v14  ;;  %v5295_v13 = vld [vmem:[#allocation5 + $0x404] ss:$24 sps:$4 sm:$0xff]   ;;  %v5290_v14 = vld [vmem:[#allocation5 + $0x3f8] ss:$24 sps:$4 sm:$0xff]  }
  0xa5   :  { %1417 = vmatprep.subr.bf16.mxu1 %v5205_v15  ;;  %v5293_v15 = vld [vmem:[#allocation5 + $0x400] ss:$24 sps:$4 sm:$0xff]  }
  0xa7   :  { %798 = vmatpush1.bf16.msra.mxu0 %v5200_v16  ;;  %v5298_v16 = vld [vmem:[#allocation5 + $0x3cc] ss:$24 sps:$4 sm:$0xff]  }
  0xa8   :  { %1418 = vmatpush1.bf16.msra.mxu1 %v5203_v17  ;;  %799 = vmatprep.subr.bf16.mxu0 %v5208_v18  ;;  %v5301_v17 = vld [vmem:[#allocation5 + $0x3d4] ss:$24 sps:$4 sm:$0xff]   ;;  %v5296_v18 = vld [vmem:[#allocation5 + $0x3c8] ss:$24 sps:$4 sm:$0xff]  }
  0xa9   :  { %1419 = vmatprep.subr.bf16.mxu1 %v5211_v19  ;;  %v5299_v19 = vld [vmem:[#allocation5 + $0x3d0] ss:$24 sps:$4 sm:$0xff]  }
  0xab   :  { %800 = vmatpush1.bf16.msra.mxu0 %v5206_v20  ;;  %v5304_v20 = vld [vmem:[#allocation5 + $0x39c] ss:$24 sps:$4 sm:$0xff]  }
  0xac   :  { %1420 = vmatpush1.bf16.msra.mxu1 %v5209_v21  ;;  %801 = vmatprep.subr.bf16.mxu0 %v5214_v22  ;;  %v5307_v21 = vld [vmem:[#allocation5 + $0x3a4] ss:$24 sps:$4 sm:$0xff]   ;;  %v5302_v22 = vld [vmem:[#allocation5 + $0x398] ss:$24 sps:$4 sm:$0xff]  }
  0xad   :  { %1421 = vmatprep.subr.bf16.mxu1 %v5217_v23  ;;  %v5305_v23 = vld [vmem:[#allocation5 + $0x3a0] ss:$24 sps:$4 sm:$0xff]  }
  0xaf   :  { %802 = vmatpush1.bf16.msra.mxu0 %v5212_v24  ;;  %v5313_v24 = vld [vmem:[#allocation5 + $0x374] ss:$24 sps:$4 sm:$0xff]  }
  0xb0   :  { %1422 = vmatpush1.bf16.msra.mxu1 %v5215_v25  ;;  %803 = vmatprep.subr.bf16.mxu0 %v5220_v26  ;;  %v5308_v25 = vld [vmem:[#allocation5 + $0x368] ss:$24 sps:$4 sm:$0xff]  }
  0xb1   :  { %1423 = vmatprep.subr.bf16.mxu1 %v5223_v27  ;;  %v5311_v26 = vld [vmem:[#allocation5 + $0x370] ss:$24 sps:$4 sm:$0xff]   ;;  %v5316_v27 = vld [vmem:[#allocation5 + $0x33c] ss:$24 sps:$4 sm:$0xff]  }
  0xb3   :  { %804 = vmatpush1.bf16.msra.mxu0 %v5218_v28  ;;  %v5319_v28 = vld [vmem:[#allocation5 + $0x344] ss:$24 sps:$4 sm:$0xff]  }
  0xb4   :  { %1424 = vmatpush1.bf16.msra.mxu1 %v5221_v29  ;;  %805 = vmatprep.subr.bf16.mxu0 %v5226_v30  ;;  %v5314_v29 = vld [vmem:[#allocation5 + $0x338] ss:$24 sps:$4 sm:$0xff]  }
  0xb5   :  { %1425 = vmatprep.subr.bf16.mxu1 %v5229_v31  ;;  %v5317_v30 = vld [vmem:[#allocation5 + $0x340] ss:$24 sps:$4 sm:$0xff]   ;;  %v5322_v31 = vld [vmem:[#allocation5 + $0x30c] ss:$24 sps:$4 sm:$0xff]  }
  0xb7   :  { %806 = vmatpush1.bf16.msra.mxu0 %v5224_v32  ;;  %v5325_v32 = vld [vmem:[#allocation5 + $0x314] ss:$24 sps:$4 sm:$0xff]  }
  0xb8   :  { %1426 = vmatpush1.bf16.msra.mxu1 %v5227_v33  ;;  %807 = vmatprep.subr.bf16.mxu0 %v5232_v34  ;;  %v5320_v33 = vld [vmem:[#allocation5 + $0x308] ss:$24 sps:$4 sm:$0xff]  }
  0xb9   :  { %1427 = vmatprep.subr.bf16.mxu1 %v5235_v35  ;;  %v5323_v34 = vld [vmem:[#allocation5 + $0x310] ss:$24 sps:$4 sm:$0xff]   ;;  %v5328_v35 = vld [vmem:[#allocation5 + $0x5dc] ss:$24 sps:$4 sm:$0xff]  }
  0xbb   :  { %808 = vmatpush2.bf16.msra.mxu0 %v5230_v36  ;;  %v5331_v36 = vld [vmem:[#allocation5 + $0x5e4] ss:$24 sps:$4 sm:$0xff]  }
  0xbc   :  { %1428 = vmatpush2.bf16.msra.mxu1 %v5233_v37  ;;  %809 = vmatprep.subr.bf16.mxu0 %v5238_v38  ;;  %v5326_v37 = vld [vmem:[#allocation5 + $0x5d8] ss:$24 sps:$4 sm:$0xff]  }
  0xbd   :  { %1429 = vmatprep.subr.bf16.mxu1 %v5241_v39  ;;  %v5329_v38 = vld [vmem:[#allocation5 + $0x5e0] ss:$24 sps:$4 sm:$0xff]   ;;  %v5334_v39 = vld [vmem:[#allocation5 + $0x5ac] ss:$24 sps:$4 sm:$0xff]  }
  0xbf   :  { %810 = vmatpush2.bf16.msra.mxu0 %v5236_v40  ;;  %v5337_v40 = vld [vmem:[#allocation5 + $0x5b4] ss:$24 sps:$4 sm:$0xff]  }
  0xc0   :  { %1430 = vmatpush2.bf16.msra.mxu1 %v5239_v41  ;;  %811 = vmatprep.subr.bf16.mxu0 %v5244_v42  ;;  %v5332_v41 = vld [vmem:[#allocation5 + $0x5a8] ss:$24 sps:$4 sm:$0xff]  }
  0xc1   :  { %1431 = vmatprep.subr.bf16.mxu1 %v5247_v43  ;;  %v5335_v42 = vld [vmem:[#allocation5 + $0x5b0] ss:$24 sps:$4 sm:$0xff]   ;;  %v5340_v43 = vld [vmem:[#allocation5 + $0x57c] ss:$24 sps:$4 sm:$0xff]  }
  0xc3   :  { %812 = vmatpush2.bf16.msra.mxu0 %v5242_v44  ;;  %v5343_v44 = vld [vmem:[#allocation5 + $0x584] ss:$24 sps:$4 sm:$0xff]  }
  0xc4   :  { %1432 = vmatpush2.bf16.msra.mxu1 %v5245_v45  ;;  %813 = vmatprep.subr.bf16.mxu0 %v5250_v46  ;;  %v5338_v45 = vld [vmem:[#allocation5 + $0x578] ss:$24 sps:$4 sm:$0xff]  }
  0xc5   :  { %1433 = vmatprep.subr.bf16.mxu1 %v5253_v47  ;;  %v5341_v46 = vld [vmem:[#allocation5 + $0x580] ss:$24 sps:$4 sm:$0xff]   ;;  %v5346_v47 = vld [vmem:[#allocation5 + $0x54c] ss:$24 sps:$4 sm:$0xff]  }
  0xc7   :  { %814 = vmatpush2.bf16.msra.mxu0 %v5248_v49  ;;  %v5349_v49 = vld [vmem:[#allocation5 + $0x554] ss:$24 sps:$4 sm:$0xff]  }
  0xc8   :  { %1434 = vmatpush2.bf16.msra.mxu1 %v5251_v50  ;;  %815 = vmatprep.subr.bf16.mxu0 %v5256_v51  ;;  %v5344_v50 = vld [vmem:[#allocation5 + $0x548] ss:$24 sps:$4 sm:$0xff]  }
  0xc9   :  { %1435 = vmatprep.subr.bf16.mxu1 %v5259_v52  ;;  %v5347_v51 = vld [vmem:[#allocation5 + $0x550] ss:$24 sps:$4 sm:$0xff]   ;;  %v5352_v52 = vld [vmem:[#allocation5 + $0x51c] ss:$24 sps:$4 sm:$0xff]  }
  0xcb   :  { %816 = vmatpush2.bf16.msra.mxu0 %v5254_v53  ;;  %v5355_v53 = vld [vmem:[#allocation5 + $0x524] ss:$24 sps:$4 sm:$0xff]  }
  0xcc   :  { %1436 = vmatpush2.bf16.msra.mxu1 %v5257_v54  ;;  %817 = vmatprep.subr.bf16.mxu0 %v5262_v55  ;;  %v5350_v54 = vld [vmem:[#allocation5 + $0x518] ss:$24 sps:$4 sm:$0xff]  }
  0xcd   :  { %1437 = vmatprep.subr.bf16.mxu1 %v5265_v56  ;;  %v5353_v55 = vld [vmem:[#allocation5 + $0x520] ss:$24 sps:$4 sm:$0xff]   ;;  %v5358_v56 = vld [vmem:[#allocation5 + $0x4ec] ss:$24 sps:$4 sm:$0xff]  }
  0xcf   :  { %818 = vmatpush2.bf16.msra.mxu0 %v5260_v57  ;;  %v5361_v57 = vld [vmem:[#allocation5 + $0x4f4] ss:$24 sps:$4 sm:$0xff]  }
  0xd0   :  { %1438 = vmatpush2.bf16.msra.mxu1 %v5263_v58  ;;  %819 = vmatprep.subr.bf16.mxu0 %v5268_v59  ;;  %v5356_v58 = vld [vmem:[#allocation5 + $0x4e8] ss:$24 sps:$4 sm:$0xff]  }
  0xd1   :  { %1439 = vmatprep.subr.bf16.mxu1 %v5271_v60  ;;  %v5359_v59 = vld [vmem:[#allocation5 + $0x4f0] ss:$24 sps:$4 sm:$0xff]   ;;  %v5364_v60 = vld [vmem:[#allocation5 + $0x4bc] ss:$24 sps:$4 sm:$0xff]  }
  0xd3   :  { %820 = vmatpush2.bf16.msra.mxu0 %v5266_v61  ;;  %v5367_v61 = vld [vmem:[#allocation5 + $0x4c4] ss:$24 sps:$4 sm:$0xff]  }
  0xd4   :  { %1440 = vmatpush2.bf16.msra.mxu1 %v5269_v62  ;;  %821 = vmatprep.subr.bf16.mxu0 %v5274_v63  ;;  %v5362_v62 = vld [vmem:[#allocation5 + $0x4b8] ss:$24 sps:$4 sm:$0xff]  }
  0xd5   :  { %1441 = vmatprep.subr.bf16.mxu1 %v5277_v0  ;;  %v5365_v63 = vld [vmem:[#allocation5 + $0x4c0] ss:$24 sps:$4 sm:$0xff]   ;;  %v5370_v0 = vld [vmem:[#allocation5 + $0x48c] ss:$24 sps:$4 sm:$0xff]  }
  0xd7   :  { %822 = vmatpush2.bf16.msra.mxu0 %v5272_v1  ;;  %v5373_v1 = vld [vmem:[#allocation5 + $0x494] ss:$24 sps:$4 sm:$0xff]  }
  0xd8   :  { %1442 = vmatpush2.bf16.msra.mxu1 %v5275_v2  ;;  %1454 = vmatprep.subr.bf16.mxu0 %v5280_v4  ;;  %v5368_v2 = vld [vmem:[#allocation5 + $0x488] ss:$24 sps:$4 sm:$0xff]  }
  0xd9   :  { %1497 = vmatprep.subr.bf16.mxu1 %v5283_v5  ;;  %v5371_v4 = vld [vmem:[#allocation5 + $0x490] ss:$24 sps:$4 sm:$0xff]   ;;  %v5376_v5 = vld [vmem:[#allocation5 + $0x754] ss:$24 sps:$4 sm:$0xff]  }
  0xda   :  { %824 = vmatmul.mubr.bf16.vlgmr.msra.gmra.mxu0 %v6143_v3 }
  0xdb   :  { %1444 = vmatmul.mubr.bf16.vlgmr.msra.gmra.mxu1 %v6143_v3  ;;  %1455 = vmatpush1.bf16.msra.mxu0 %v5278_v6  ;;  %v5379_v6 = vld [vmem:[#allocation5 + $0x75c] ss:$24 sps:$4 sm:$0xff]  }
  0xdc   :  { %1498 = vmatpush1.bf16.msra.mxu1 %v5281_v7  ;;  %1456 = vmatprep.subr.bf16.mxu0 %v5286_v8  ;;  %v5374_v7 = vld [vmem:[#allocation5 + $0x750] ss:$24 sps:$4 sm:$0xff]  }
  0xdd   :  { %1499 = vmatprep.subr.bf16.mxu1 %v5289_v9  ;;  %1486 = vmatprep.mubr.bf16.mxu0 %v6139_v48  ;;  %v5377_v8 = vld [vmem:[#allocation5 + $0x758] ss:$24 sps:$4 sm:$0xff]   ;;  %v5382_v9 = vld [vmem:[#allocation5 + $0x724] ss:$24 sps:$4 sm:$0xff]  }
  0xde   :  { %1529 = vmatprep.mubr.bf16.mxu1 %v6139_v48  ;;  %v5310_v48 = vld [vmem:[#allocation5 + $0x36c] ss:$24 sps:$4 sm:$0xff]  }
  0xdf   :  { %1457 = vmatpush1.bf16.msra.mxu0 %v5284_v10  ;;  %v5385_v10 = vld [vmem:[#allocation5 + $0x72c] ss:$24 sps:$4 sm:$0xff]  }
  0xe0   :  { %1500 = vmatpush1.bf16.msra.mxu1 %v5287_v11  ;;  %1458 = vmatprep.subr.bf16.mxu0 %v5292_v12  ;;  %v5380_v11 = vld [vmem:[#allocation5 + $0x720] ss:$24 sps:$4 sm:$0xff]  }
  0xe1   :  { %1501 = vmatprep.subr.bf16.mxu1 %v5295_v13  ;;  %v5383_v12 = vld [vmem:[#allocation5 + $0x728] ss:$24 sps:$4 sm:$0xff]   ;;  %v5388_v13 = vld [vmem:[#allocation5 + $0x6f4] ss:$24 sps:$4 sm:$0xff]  }
  0xe3   :  { %1459 = vmatpush1.bf16.msra.mxu0 %v5290_v14  ;;  %v5391_v14 = vld [vmem:[#allocation5 + $0x6fc] ss:$24 sps:$4 sm:$0xff]  }
  0xe4   :  { %1502 = vmatpush1.bf16.msra.mxu1 %v5293_v15  ;;  %1460 = vmatprep.subr.bf16.mxu0 %v5298_v16  ;;  %v6155_v15 = vld [vmem:[#allocation2 + $0x4] ss:$8 sps:$4 sm:$0xff]   ;;  %v5386_v16 = vld [vmem:[#allocation5 + $0x6f0] ss:$24 sps:$4 sm:$0xff]  }
  0xe5   :  { %1503 = vmatprep.subr.bf16.mxu1 %v5301_v17  ;;  %v5389_v17 = vld [vmem:[#allocation5 + $0x6f8] ss:$24 sps:$4 sm:$0xff]  }
  0xe7   :  { %1461 = vmatpush1.bf16.msra.mxu0 %v5296_v18  ;;  %v5394_v18 = vld [vmem:[#allocation5 + $0x6c4] ss:$24 sps:$4 sm:$0xff]  }
  0xe8   :  { %1504 = vmatpush1.bf16.msra.mxu1 %v5299_v19  ;;  %1462 = vmatprep.subr.bf16.mxu0 %v5304_v20  ;;  %v5392_v19 = vld [vmem:[#allocation5 + $0x6c0] ss:$24 sps:$4 sm:$0xff]  }
  0xe9   :  { %1505 = vmatprep.subr.bf16.mxu1 %v5307_v21  ;;  %v5395_v20 = vld [vmem:[#allocation5 + $0x6c8] ss:$24 sps:$4 sm:$0xff]   ;;  %v5400_v21 = vld [vmem:[#allocation5 + $0x694] ss:$24 sps:$4 sm:$0xff]  }
  0xeb   :  { %1463 = vmatpush1.bf16.msra.mxu0 %v5302_v22  ;;  %v5403_v22 = vld [vmem:[#allocation5 + $0x69c] ss:$24 sps:$4 sm:$0xff]  }
  0xec   :  { %1506 = vmatpush1.bf16.msra.mxu1 %v5305_v23  ;;  %1464 = vmatprep.subr.bf16.mxu0 %v5310_v48  ;;  %v5398_v23 = vld [vmem:[#allocation5 + $0x690] ss:$24 sps:$4 sm:$0xff]  }
  0xed   :  { %1507 = vmatprep.subr.bf16.mxu1 %v5313_v24  ;;  %v5401_v48 = vld [vmem:[#allocation5 + $0x698] ss:$24 sps:$4 sm:$0xff]   ;;  %v5406_v24 = vld [vmem:[#allocation5 + $0x664] ss:$24 sps:$4 sm:$0xff]  }
  0xef   :  { %1465 = vmatpush1.bf16.msra.mxu0 %v5308_v25  ;;  %v5409_v25 = vld [vmem:[#allocation5 + $0x66c] ss:$24 sps:$4 sm:$0xff]  }
  0xf0   :  { %1508 = vmatpush1.bf16.msra.mxu1 %v5311_v26  ;;  %1466 = vmatprep.subr.bf16.mxu0 %v5316_v27  ;;  %v5404_v26 = vld [vmem:[#allocation5 + $0x660] ss:$24 sps:$4 sm:$0xff]  }
  0xf1   :  { %1509 = vmatprep.subr.bf16.mxu1 %v5319_v28  ;;  %v5407_v27 = vld [vmem:[#allocation5 + $0x668] ss:$24 sps:$4 sm:$0xff]   ;;  %v5412_v28 = vld [vmem:[#allocation5 + $0x634] ss:$24 sps:$4 sm:$0xff]  }
  0xf3   :  { %1467 = vmatpush1.bf16.msra.mxu0 %v5314_v29  ;;  %v5415_v29 = vld [vmem:[#allocation5 + $0x63c] ss:$24 sps:$4 sm:$0xff]  }
  0xf4   :  { %1510 = vmatpush1.bf16.msra.mxu1 %v5317_v30  ;;  %1468 = vmatprep.subr.bf16.mxu0 %v5322_v31  ;;  %v5410_v30 = vld [vmem:[#allocation5 + $0x630] ss:$24 sps:$4 sm:$0xff]  }
  0xf5   :  { %1511 = vmatprep.subr.bf16.mxu1 %v5325_v32  ;;  %v5413_v31 = vld [vmem:[#allocation5 + $0x638] ss:$24 sps:$4 sm:$0xff]   ;;  %v5418_v32 = vld [vmem:[#allocation5 + $0x604] ss:$24 sps:$4 sm:$0xff]  }
  0xf7   :  { %1469 = vmatpush1.bf16.msra.mxu0 %v5320_v33  ;;  %v5421_v33 = vld [vmem:[#allocation5 + $0x60c] ss:$24 sps:$4 sm:$0xff]  }
  0xf8   :  { %1512 = vmatpush1.bf16.msra.mxu1 %v5323_v34  ;;  %1470 = vmatprep.subr.bf16.mxu0 %v5328_v35  ;;  %v5416_v34 = vld [vmem:[#allocation5 + $0x600] ss:$24 sps:$4 sm:$0xff]  }
  0xf9   :  { %1513 = vmatprep.subr.bf16.mxu1 %v5331_v36  ;;  %v5419_v35 = vld [vmem:[#allocation5 + $0x608] ss:$24 sps:$4 sm:$0xff]   ;;  %v5424_v36 = vld [vmem:[#allocation5 + $0x8d4] ss:$24 sps:$4 sm:$0xff]  }
  0xfb   :  { %1471 = vmatpush2.bf16.msra.mxu0 %v5326_v37  ;;  %v5427_v37 = vld [vmem:[#allocation5 + $0x8dc] ss:$24 sps:$4 sm:$0xff]  }
  0xfc   :  { %1514 = vmatpush2.bf16.msra.mxu1 %v5329_v38  ;;  %1472 = vmatprep.subr.bf16.mxu0 %v5334_v39  ;;  %v5422_v38 = vld [vmem:[#allocation5 + $0x8d0] ss:$24 sps:$4 sm:$0xff]  }
  0xfd   :  { %1515 = vmatprep.subr.bf16.mxu1 %v5337_v40  ;;  %v5425_v39 = vld [vmem:[#allocation5 + $0x8d8] ss:$24 sps:$4 sm:$0xff]   ;;  %v5430_v40 = vld [vmem:[#allocation5 + $0x8a4] ss:$24 sps:$4 sm:$0xff]  }
  0xff   :  { %1473 = vmatpush2.bf16.msra.mxu0 %v5332_v41  ;;  %v5433_v41 = vld [vmem:[#allocation5 + $0x8ac] ss:$24 sps:$4 sm:$0xff]  }
 0x100   :  { %1516 = vmatpush2.bf16.msra.mxu1 %v5335_v42  ;;  %1474 = vmatprep.subr.bf16.mxu0 %v5340_v43  ;;  %v5428_v42 = vld [vmem:[#allocation5 + $0x8a0] ss:$24 sps:$4 sm:$0xff]  }
 0x101   :  { %1517 = vmatprep.subr.bf16.mxu1 %v5343_v44  ;;  %v5431_v43 = vld [vmem:[#allocation5 + $0x8a8] ss:$24 sps:$4 sm:$0xff]   ;;  %v5436_v44 = vld [vmem:[#allocation5 + $0x874] ss:$24 sps:$4 sm:$0xff]  }
 0x103   :  { %1475 = vmatpush2.bf16.msra.mxu0 %v5338_v45  ;;  %v5439_v45 = vld [vmem:[#allocation5 + $0x87c] ss:$24 sps:$4 sm:$0xff]  }
 0x104   :  { %1518 = vmatpush2.bf16.msra.mxu1 %v5341_v46  ;;  %1476 = vmatprep.subr.bf16.mxu0 %v5346_v47  ;;  %v5434_v46 = vld [vmem:[#allocation5 + $0x870] ss:$24 sps:$4 sm:$0xff]  }
 0x105   :  { %1519 = vmatprep.subr.bf16.mxu1 %v5349_v49  ;;  %v5437_v47 = vld [vmem:[#allocation5 + $0x878] ss:$24 sps:$4 sm:$0xff]   ;;  %v5442_v49 = vld [vmem:[#allocation5 + $0x844] ss:$24 sps:$4 sm:$0xff]  }
 0x107   :  { %1477 = vmatpush2.bf16.msra.mxu0 %v5344_v50  ;;  %v5445_v50 = vld [vmem:[#allocation5 + $0x84c] ss:$24 sps:$4 sm:$0xff]  }
 0x108   :  { %1520 = vmatpush2.bf16.msra.mxu1 %v5347_v51  ;;  %1478 = vmatprep.subr.bf16.mxu0 %v5352_v52  ;;  %v5440_v51 = vld [vmem:[#allocation5 + $0x840] ss:$24 sps:$4 sm:$0xff]  }
 0x109   :  { %1521 = vmatprep.subr.bf16.mxu1 %v5355_v53  ;;  %v5443_v52 = vld [vmem:[#allocation5 + $0x848] ss:$24 sps:$4 sm:$0xff]   ;;  %v5448_v53 = vld [vmem:[#allocation5 + $0x814] ss:$24 sps:$4 sm:$0xff]  }
 0x10b   :  { %1479 = vmatpush2.bf16.msra.mxu0 %v5350_v54  ;;  %v5451_v54 = vld [vmem:[#allocation5 + $0x81c] ss:$24 sps:$4 sm:$0xff]  }
 0x10c   :  { %1522 = vmatpush2.bf16.msra.mxu1 %v5353_v55  ;;  %1480 = vmatprep.subr.bf16.mxu0 %v5358_v56  ;;  %v5446_v55 = vld [vmem:[#allocation5 + $0x810] ss:$24 sps:$4 sm:$0xff]  }
 0x10d   :  { %1523 = vmatprep.subr.bf16.mxu1 %v5361_v57  ;;  %v5449_v56 = vld [vmem:[#allocation5 + $0x818] ss:$24 sps:$4 sm:$0xff]   ;;  %v5454_v57 = vld [vmem:[#allocation5 + $0x7e4] ss:$24 sps:$4 sm:$0xff]  }
 0x10f   :  { %1481 = vmatpush2.bf16.msra.mxu0 %v5356_v58  ;;  %v5457_v58 = vld [vmem:[#allocation5 + $0x7ec] ss:$24 sps:$4 sm:$0xff]  }
 0x110   :  { %1524 = vmatpush2.bf16.msra.mxu1 %v5359_v59  ;;  %1482 = vmatprep.subr.bf16.mxu0 %v5364_v60  ;;  %v5452_v59 = vld [vmem:[#allocation5 + $0x7e0] ss:$24 sps:$4 sm:$0xff]  }
 0x111   :  { %1525 = vmatprep.subr.bf16.mxu1 %v5367_v61  ;;  %v5455_v60 = vld [vmem:[#allocation5 + $0x7e8] ss:$24 sps:$4 sm:$0xff]   ;;  %v5460_v61 = vld [vmem:[#allocation5 + $0x7b4] ss:$24 sps:$4 sm:$0xff]  }
 0x113   :  { %1483 = vmatpush2.bf16.msra.mxu0 %v5362_v62  ;;  %v5463_v62 = vld [vmem:[#allocation5 + $0x7bc] ss:$24 sps:$4 sm:$0xff]  }
 0x114   :  { %1526 = vmatpush2.bf16.msra.mxu1 %v5365_v63  ;;  %1484 = vmatprep.subr.bf16.mxu0 %v5370_v0  ;;  %v5458_v63 = vld [vmem:[#allocation5 + $0x7b0] ss:$24 sps:$4 sm:$0xff]  }
 0x115   :  { %1527 = vmatprep.subr.bf16.mxu1 %v5373_v1  ;;  %v5461_v0 = vld [vmem:[#allocation5 + $0x7b8] ss:$24 sps:$4 sm:$0xff]   ;;  %v5466_v1 = vld [vmem:[#allocation5 + $0x784] ss:$24 sps:$4 sm:$0xff]  }
 0x117   :  { %1485 = vmatpush2.bf16.msra.mxu0 %v5368_v2  ;;  %v5469_v2 = vld [vmem:[#allocation5 + $0x78c] ss:$24 sps:$4 sm:$0xff]  }
 0x118   :  { %1528 = vmatpush2.bf16.msra.mxu1 %v5371_v4  ;;  %2129 = vmatprep.subr.bf16.mxu0 %v5376_v5  ;;  %v5464_v4 = vld [vmem:[#allocation5 + $0x780] ss:$24 sps:$4 sm:$0xff]  }
 0x119   :  { %2172 = vmatprep.subr.bf16.mxu1 %v5379_v6  ;;  %v5467_v5 = vld [vmem:[#allocation5 + $0x788] ss:$24 sps:$4 sm:$0xff]   ;;  %v5472_v6 = vld [vmem:[#allocation5 + $0x764] ss:$24 sps:$4 sm:$0xff]  }
 0x11a   :  { %1487 = vmatmul.mubr.bf16.vlgmr.msra.gmra.mxu0 %v6143_v3 }
 0x11b   :  { %1530 = vmatmul.mubr.bf16.vlgmr.msra.gmra.mxu1 %v6143_v3  ;;  %2130 = vmatpush1.bf16.msra.mxu0 %v5374_v7  ;;  %v5397_v3 = vld [vmem:[#allocation5 + $0x6cc] ss:$24 sps:$4 sm:$0xff]  }
 0x11c   :  { %2173 = vmatpush1.bf16.msra.mxu1 %v5377_v8  ;;  %2131 = vmatprep.subr.bf16.mxu0 %v5382_v9  ;;  %v5475_v7 = vld [vmem:[#allocation5 + $0xa54] ss:$24 sps:$4 sm:$0xff]   ;;  %v5470_v8 = vld [vmem:[#allocation5 + $0x760] ss:$24 sps:$4 sm:$0xff]   ;;  %v5473_v9 = vld [vmem:[#allocation5 + $0xa50] ss:$24 sps:$4 sm:$0xff]  }
 0x11d   :  { %2174 = vmatprep.subr.bf16.mxu1 %v5385_v10  ;;  %2161 = vmatprep.mubr.bf16.mxu0 %v6155_v15  ;;  %v5478_v10 = vld [vmem:[#allocation5 + $0x734] ss:$24 sps:$4 sm:$0xff]  }
 0x11e   :  { %2204 = vmatprep.mubr.bf16.mxu1 %v6155_v15 }
 0x11f   :  { %2132 = vmatpush1.bf16.msra.mxu0 %v5380_v11  ;;  %v5481_v11 = vld [vmem:[#allocation5 + $0xa24] ss:$24 sps:$4 sm:$0xff]  }
 0x120   :  { %2175 = vmatpush1.bf16.msra.mxu1 %v5383_v12  ;;  %2133 = vmatprep.subr.bf16.mxu0 %v5388_v13  ;;  %v6159_v12 = vld [vmem:[#allocation2] ss:$8 sps:$4 sm:$0xff]  }
 0x121   :  { %2176 = vmatprep.subr.bf16.mxu1 %v5391_v14  ;;  %v5476_v13 = vld [vmem:[#allocation5 + $0x730] ss:$24 sps:$4 sm:$0xff]   ;;  %v5479_v14 = vld [vmem:[#allocation5 + $0xa20] ss:$24 sps:$4 sm:$0xff]  }
 0x123   :  { %2134 = vmatpush1.bf16.msra.mxu0 %v5386_v16  ;;  %v5484_v16 = vld [vmem:[#allocation5 + $0x704] ss:$24 sps:$4 sm:$0xff]  }
 0x124   :  { %2177 = vmatpush1.bf16.msra.mxu1 %v5389_v17  ;;  %2135 = vmatprep.subr.bf16.mxu0 %v5394_v18  ;;  %v5487_v17 = vld [vmem:[#allocation5 + $0x9f4] ss:$24 sps:$4 sm:$0xff]   ;;  %v5482_v18 = vld [vmem:[#allocation5 + $0x700] ss:$24 sps:$4 sm:$0xff]  }
 0x125   :  { %2178 = vmatprep.subr.bf16.mxu1 %v5397_v3  ;;  %v5485_v3 = vld [vmem:[#allocation5 + $0x9f0] ss:$24 sps:$4 sm:$0xff]  }
 0x127   :  { %2136 = vmatpush1.bf16.msra.mxu0 %v5392_v19  ;;  %v5490_v19 = vld [vmem:[#allocation5 + $0x6d4] ss:$24 sps:$4 sm:$0xff]  }
 0x128   :  { %2179 = vmatpush1.bf16.msra.mxu1 %v5395_v20  ;;  %2137 = vmatprep.subr.bf16.mxu0 %v5400_v21  ;;  %v5493_v20 = vld [vmem:[#allocation5 + $0x9c4] ss:$24 sps:$4 sm:$0xff]   ;;  %v5488_v21 = vld [vmem:[#allocation5 + $0x6d0] ss:$24 sps:$4 sm:$0xff]  }
 0x129   :  { %2180 = vmatprep.subr.bf16.mxu1 %v5403_v22  ;;  %v5491_v22 = vld [vmem:[#allocation5 + $0x9c0] ss:$24 sps:$4 sm:$0xff]  }
 0x12b   :  { %2138 = vmatpush1.bf16.msra.mxu0 %v5398_v23  ;;  %v5496_v23 = vld [vmem:[#allocation5 + $0x6a4] ss:$24 sps:$4 sm:$0xff]  }
 0x12c   :  { %2181 = vmatpush1.bf16.msra.mxu1 %v5401_v48  ;;  %2139 = vmatprep.subr.bf16.mxu0 %v5406_v24  ;;  %v5499_v48 = vld [vmem:[#allocation5 + $0x994] ss:$24 sps:$4 sm:$0xff]   ;;  %v5494_v24 = vld [vmem:[#allocation5 + $0x6a0] ss:$24 sps:$4 sm:$0xff]  }
 0x12d   :  { %2182 = vmatprep.subr.bf16.mxu1 %v5409_v25  ;;  %v5497_v25 = vld [vmem:[#allocation5 + $0x990] ss:$24 sps:$4 sm:$0xff]  }
 0x12f   :  { %2140 = vmatpush1.bf16.msra.mxu0 %v5404_v26  ;;  %v5502_v26 = vld [vmem:[#allocation5 + $0x674] ss:$24 sps:$4 sm:$0xff]  }
 0x130   :  { %2183 = vmatpush1.bf16.msra.mxu1 %v5407_v27  ;;  %2141 = vmatprep.subr.bf16.mxu0 %v5412_v28  ;;  %v5505_v27 = vld [vmem:[#allocation5 + $0x964] ss:$24 sps:$4 sm:$0xff]   ;;  %v5500_v28 = vld [vmem:[#allocation5 + $0x670] ss:$24 sps:$4 sm:$0xff]  }
 0x131   :  { %2184 = vmatprep.subr.bf16.mxu1 %v5415_v29  ;;  %v5503_v29 = vld [vmem:[#allocation5 + $0x960] ss:$24 sps:$4 sm:$0xff]  }
 0x133   :  { %2142 = vmatpush1.bf16.msra.mxu0 %v5410_v30  ;;  %v5508_v30 = vld [vmem:[#allocation5 + $0x644] ss:$24 sps:$4 sm:$0xff]  }
 0x134   :  { %2185 = vmatpush1.bf16.msra.mxu1 %v5413_v31  ;;  %2143 = vmatprep.subr.bf16.mxu0 %v5418_v32  ;;  %v5511_v31 = vld [vmem:[#allocation5 + $0x934] ss:$24 sps:$4 sm:$0xff]   ;;  %v5506_v32 = vld [vmem:[#allocation5 + $0x640] ss:$24 sps:$4 sm:$0xff]  }
 0x135   :  { %2186 = vmatprep.subr.bf16.mxu1 %v5421_v33  ;;  %v5509_v33 = vld [vmem:[#allocation5 + $0x930] ss:$24 sps:$4 sm:$0xff]  }
 0x137   :  { %2144 = vmatpush1.bf16.msra.mxu0 %v5416_v34  ;;  %v5514_v34 = vld [vmem:[#allocation5 + $0x614] ss:$24 sps:$4 sm:$0xff]  }
 0x138   :  { %2187 = vmatpush1.bf16.msra.mxu1 %v5419_v35  ;;  %2145 = vmatprep.subr.bf16.mxu0 %v5424_v36  ;;  %v5517_v35 = vld [vmem:[#allocation5 + $0x904] ss:$24 sps:$4 sm:$0xff]   ;;  %v5512_v36 = vld [vmem:[#allocation5 + $0x610] ss:$24 sps:$4 sm:$0xff]  }
 0x139   :  { %2188 = vmatprep.subr.bf16.mxu1 %v5427_v37  ;;  %v5515_v37 = vld [vmem:[#allocation5 + $0x900] ss:$24 sps:$4 sm:$0xff]  }
 0x13b   :  { %2146 = vmatpush2.bf16.msra.mxu0 %v5422_v38  ;;  %v5520_v38 = vld [vmem:[#allocation5 + $0x8e4] ss:$24 sps:$4 sm:$0xff]  }
 0x13c   :  { %2189 = vmatpush2.bf16.msra.mxu1 %v5425_v39  ;;  %2147 = vmatprep.subr.bf16.mxu0 %v5430_v40  ;;  %v5523_v39 = vld [vmem:[#allocation5 + $0xbd4] ss:$24 sps:$4 sm:$0xff]   ;;  %v5518_v40 = vld [vmem:[#allocation5 + $0x8e0] ss:$24 sps:$4 sm:$0xff]  }
 0x13d   :  { %2190 = vmatprep.subr.bf16.mxu1 %v5433_v41  ;;  %v5521_v41 = vld [vmem:[#allocation5 + $0xbd0] ss:$24 sps:$4 sm:$0xff]  }
 0x13f   :  { %2148 = vmatpush2.bf16.msra.mxu0 %v5428_v42  ;;  %v5526_v42 = vld [vmem:[#allocation5 + $0x8b4] ss:$24 sps:$4 sm:$0xff]  }
 0x140   :  { %2191 = vmatpush2.bf16.msra.mxu1 %v5431_v43  ;;  %2149 = vmatprep.subr.bf16.mxu0 %v5436_v44  ;;  %v5529_v43 = vld [vmem:[#allocation5 + $0xba4] ss:$24 sps:$4 sm:$0xff]   ;;  %v5524_v44 = vld [vmem:[#allocation5 + $0x8b0] ss:$24 sps:$4 sm:$0xff]  }
 0x141   :  { %2192 = vmatprep.subr.bf16.mxu1 %v5439_v45  ;;  %v5527_v45 = vld [vmem:[#allocation5 + $0xba0] ss:$24 sps:$4 sm:$0xff]  }
 0x143   :  { %2150 = vmatpush2.bf16.msra.mxu0 %v5434_v46  ;;  %v5532_v46 = vld [vmem:[#allocation5 + $0x884] ss:$24 sps:$4 sm:$0xff]  }
 0x144   :  { %2193 = vmatpush2.bf16.msra.mxu1 %v5437_v47  ;;  %2151 = vmatprep.subr.bf16.mxu0 %v5442_v49  ;;  %v5535_v47 = vld [vmem:[#allocation5 + $0xb74] ss:$24 sps:$4 sm:$0xff]   ;;  %v5530_v49 = vld [vmem:[#allocation5 + $0x880] ss:$24 sps:$4 sm:$0xff]  }
 0x145   :  { %2194 = vmatprep.subr.bf16.mxu1 %v5445_v50  ;;  %v5533_v50 = vld [vmem:[#allocation5 + $0xb70] ss:$24 sps:$4 sm:$0xff]  }
 0x147   :  { %2152 = vmatpush2.bf16.msra.mxu0 %v5440_v51  ;;  %v5538_v51 = vld [vmem:[#allocation5 + $0x854] ss:$24 sps:$4 sm:$0xff]  }
 0x148   :  { %2195 = vmatpush2.bf16.msra.mxu1 %v5443_v52  ;;  %2153 = vmatprep.subr.bf16.mxu0 %v5448_v53  ;;  %v5541_v52 = vld [vmem:[#allocation5 + $0xb44] ss:$24 sps:$4 sm:$0xff]   ;;  %v5536_v53 = vld [vmem:[#allocation5 + $0x850] ss:$24 sps:$4 sm:$0xff]  }
 0x149   :  { %2196 = vmatprep.subr.bf16.mxu1 %v5451_v54  ;;  %v5539_v54 = vld [vmem:[#allocation5 + $0xb40] ss:$24 sps:$4 sm:$0xff]  }
 0x14b   :  { %2154 = vmatpush2.bf16.msra.mxu0 %v5446_v55  ;;  %v5544_v55 = vld [vmem:[#allocation5 + $0x824] ss:$24 sps:$4 sm:$0xff]  }
 0x14c   :  { %2197 = vmatpush2.bf16.msra.mxu1 %v5449_v56  ;;  %2155 = vmatprep.subr.bf16.mxu0 %v5454_v57  ;;  %v5547_v56 = vld [vmem:[#allocation5 + $0xb14] ss:$24 sps:$4 sm:$0xff]   ;;  %v5542_v57 = vld [vmem:[#allocation5 + $0x820] ss:$24 sps:$4 sm:$0xff]  }
 0x14d   :  { %2198 = vmatprep.subr.bf16.mxu1 %v5457_v58  ;;  %v5545_v58 = vld [vmem:[#allocation5 + $0xb10] ss:$24 sps:$4 sm:$0xff]  }
 0x14f   :  { %2156 = vmatpush2.bf16.msra.mxu0 %v5452_v59  ;;  %v5550_v59 = vld [vmem:[#allocation5 + $0x7f4] ss:$24 sps:$4 sm:$0xff]  }
 0x150   :  { %2199 = vmatpush2.bf16.msra.mxu1 %v5455_v60  ;;  %2157 = vmatprep.subr.bf16.mxu0 %v5460_v61  ;;  %v5553_v60 = vld [vmem:[#allocation5 + $0xae4] ss:$24 sps:$4 sm:$0xff]   ;;  %v5548_v61 = vld [vmem:[#allocation5 + $0x7f0] ss:$24 sps:$4 sm:$0xff]  }
 0x151   :  { %2200 = vmatprep.subr.bf16.mxu1 %v5463_v62  ;;  %v5551_v62 = vld [vmem:[#allocation5 + $0xae0] ss:$24 sps:$4 sm:$0xff]  }
 0x153   :  { %2158 = vmatpush2.bf16.msra.mxu0 %v5458_v63  ;;  %v5556_v63 = vld [vmem:[#allocation5 + $0x7c4] ss:$24 sps:$4 sm:$0xff]  }
 0x154   :  { %2201 = vmatpush2.bf16.msra.mxu1 %v5461_v0  ;;  %2159 = vmatprep.subr.bf16.mxu0 %v5466_v1  ;;  %v5559_v0 = vld [vmem:[#allocation5 + $0xab4] ss:$24 sps:$4 sm:$0xff]   ;;  %v5554_v1 = vld [vmem:[#allocation5 + $0x7c0] ss:$24 sps:$4 sm:$0xff]  }
 0x155   :  { %2202 = vmatprep.subr.bf16.mxu1 %v5469_v2  ;;  %v5557_v2 = vld [vmem:[#allocation5 + $0xab0] ss:$24 sps:$4 sm:$0xff]  }
 0x157   :  { %2160 = vmatpush2.bf16.msra.mxu0 %v5464_v4  ;;  %v5562_v4 = vld [vmem:[#allocation5 + $0x794] ss:$24 sps:$4 sm:$0xff]  }
 0x158   :  { %2203 = vmatpush2.bf16.msra.mxu1 %v5467_v5  ;;  %2215 = vmatprep.subr.bf16.mxu0 %v5472_v6  ;;  %v5565_v5 = vld [vmem:[#allocation5 + $0xa84] ss:$24 sps:$4 sm:$0xff]   ;;  %v5560_v6 = vld [vmem:[#allocation5 + $0x790] ss:$24 sps:$4 sm:$0xff]  }
 0x159   :  { %2847 = vmatprep.subr.bf16.mxu1 %v5475_v7  ;;  %v5563_v7 = vld [vmem:[#allocation5 + $0xa80] ss:$24 sps:$4 sm:$0xff]  }
 0x15a   :  { %2162 = vmatmul.mubr.bf16.vlgmr.msra.gmra.mxu0 %v6159_v12 }
 0x15b   :  { %2205 = vmatmul.mubr.bf16.vlgmr.msra.gmra.mxu1 %v6159_v12  ;;  %2216 = vmatpush1.bf16.msra.mxu0 %v5470_v8  ;;  %v5568_v8 = vld [vmem:[#allocation5 + $0xa5c] ss:$24 sps:$4 sm:$0xff]  }
 0x15c   :  { %2848 = vmatpush1.bf16.msra.mxu1 %v5473_v9  ;;  %2217 = vmatprep.subr.bf16.mxu0 %v5478_v10  ;;  %v5571_v9 = vld [vmem:[#allocation5 + $0xa64] ss:$24 sps:$4 sm:$0xff]   ;;  %v5566_v10 = vld [vmem:[#allocation5 + $0xa58] ss:$24 sps:$4 sm:$0xff]  }
 0x15d   :  { %2849 = vmatprep.subr.bf16.mxu1 %v5481_v11  ;;  %2247 = vmatprep.mubr.bf16.mxu0 %v6155_v15  ;;  %v5569_v11 = vld [vmem:[#allocation5 + $0xa60] ss:$24 sps:$4 sm:$0xff]  }
 0x15e   :  { %2879 = vmatprep.mubr.bf16.mxu1 %v6155_v15 }
 0x15f   :  { %2218 = vmatpush1.bf16.msra.mxu0 %v5476_v13  ;;  %v5574_v13 = vld [vmem:[#allocation5 + $0xa2c] ss:$24 sps:$4 sm:$0xff]  }
 0x160   :  { %2850 = vmatpush1.bf16.msra.mxu1 %v5479_v14  ;;  %2219 = vmatprep.subr.bf16.mxu0 %v5484_v16  ;;  %v5577_v14 = vld [vmem:[#allocation5 + $0xa34] ss:$24 sps:$4 sm:$0xff]   ;;  %v5572_v16 = vld [vmem:[#allocation5 + $0xa28] ss:$24 sps:$4 sm:$0xff]  }
 0x161   :  { %2851 = vmatprep.subr.bf16.mxu1 %v5487_v17  ;;  %v5575_v17 = vld [vmem:[#allocation5 + $0xa30] ss:$24 sps:$4 sm:$0xff]  }
 0x163   :  { %2220 = vmatpush1.bf16.msra.mxu0 %v5482_v18  ;;  %v5580_v18 = vld [vmem:[#allocation5 + $0x9fc] ss:$24 sps:$4 sm:$0xff]  }
 0x164   :  { %2852 = vmatpush1.bf16.msra.mxu1 %v5485_v3  ;;  %2221 = vmatprep.subr.bf16.mxu0 %v5490_v19  ;;  %v5583_v3 = vld [vmem:[#allocation5 + $0xa04] ss:$24 sps:$4 sm:$0xff]   ;;  %v5578_v19 = vld [vmem:[#allocation5 + $0x9f8] ss:$24 sps:$4 sm:$0xff]  }
 0x165   :  { %2853 = vmatprep.subr.bf16.mxu1 %v5493_v20  ;;  %v5581_v20 = vld [vmem:[#allocation5 + $0xa00] ss:$24 sps:$4 sm:$0xff]  }
 0x167   :  { %2222 = vmatpush1.bf16.msra.mxu0 %v5488_v21  ;;  %v5586_v21 = vld [vmem:[#allocation5 + $0x9cc] ss:$24 sps:$4 sm:$0xff]  }
 0x168   :  { %2854 = vmatpush1.bf16.msra.mxu1 %v5491_v22  ;;  %2223 = vmatprep.subr.bf16.mxu0 %v5496_v23  ;;  %v5589_v22 = vld [vmem:[#allocation5 + $0x9d4] ss:$24 sps:$4 sm:$0xff]   ;;  %v5584_v23 = vld [vmem:[#allocation5 + $0x9c8] ss:$24 sps:$4 sm:$0xff]  }
 0x169   :  { %2855 = vmatprep.subr.bf16.mxu1 %v5499_v48  ;;  %v5587_v48 = vld [vmem:[#allocation5 + $0x9d0] ss:$24 sps:$4 sm:$0xff]  }
 0x16b   :  { %2224 = vmatpush1.bf16.msra.mxu0 %v5494_v24  ;;  %v5592_v24 = vld [vmem:[#allocation5 + $0x99c] ss:$24 sps:$4 sm:$0xff]  }
 0x16c   :  { %2856 = vmatpush1.bf16.msra.mxu1 %v5497_v25  ;;  %2225 = vmatprep.subr.bf16.mxu0 %v5502_v26  ;;  %v5595_v25 = vld [vmem:[#allocation5 + $0x9a4] ss:$24 sps:$4 sm:$0xff]   ;;  %v5590_v26 = vld [vmem:[#allocation5 + $0x998] ss:$24 sps:$4 sm:$0xff]  }
 0x16d   :  { %2857 = vmatprep.subr.bf16.mxu1 %v5505_v27  ;;  %v5593_v27 = vld [vmem:[#allocation5 + $0x9a0] ss:$24 sps:$4 sm:$0xff]  }
 0x16f   :  { %2226 = vmatpush1.bf16.msra.mxu0 %v5500_v28  ;;  %v5598_v28 = vld [vmem:[#allocation5 + $0x96c] ss:$24 sps:$4 sm:$0xff]  }
 0x170   :  { %2858 = vmatpush1.bf16.msra.mxu1 %v5503_v29  ;;  %2227 = vmatprep.subr.bf16.mxu0 %v5508_v30  ;;  %v5596_v29 = vld [vmem:[#allocation5 + $0x968] ss:$24 sps:$4 sm:$0xff]  }
 0x171   :  { %2859 = vmatprep.subr.bf16.mxu1 %v5511_v31  ;;  %v5599_v30 = vld [vmem:[#allocation5 + $0x970] ss:$24 sps:$4 sm:$0xff]   ;;  %v5604_v31 = vld [vmem:[#allocation5 + $0x93c] ss:$24 sps:$4 sm:$0xff]  }
 0x173   :  { %2228 = vmatpush1.bf16.msra.mxu0 %v5506_v32  ;;  %v5607_v32 = vld [vmem:[#allocation5 + $0x944] ss:$24 sps:$4 sm:$0xff]  }
 0x174   :  { %2860 = vmatpush1.bf16.msra.mxu1 %v5509_v33  ;;  %2229 = vmatprep.subr.bf16.mxu0 %v5514_v34  ;;  %v5602_v33 = vld [vmem:[#allocation5 + $0x938] ss:$24 sps:$4 sm:$0xff]  }
 0x175   :  { %2861 = vmatprep.subr.bf16.mxu1 %v5517_v35  ;;  %v5605_v34 = vld [vmem:[#allocation5 + $0x940] ss:$24 sps:$4 sm:$0xff]   ;;  %v5610_v35 = vld [vmem:[#allocation5 + $0x90c] ss:$24 sps:$4 sm:$0xff]  }
 0x177   :  { %2230 = vmatpush1.bf16.msra.mxu0 %v5512_v36  ;;  %v5613_v36 = vld [vmem:[#allocation5 + $0x914] ss:$24 sps:$4 sm:$0xff]  }
 0x178   :  { %2862 = vmatpush1.bf16.msra.mxu1 %v5515_v37  ;;  %2231 = vmatprep.subr.bf16.mxu0 %v5520_v38  ;;  %v5608_v37 = vld [vmem:[#allocation5 + $0x908] ss:$24 sps:$4 sm:$0xff]  }
 0x179   :  { %2863 = vmatprep.subr.bf16.mxu1 %v5523_v39  ;;  %v5611_v38 = vld [vmem:[#allocation5 + $0x910] ss:$24 sps:$4 sm:$0xff]   ;;  %v5616_v39 = vld [vmem:[#allocation5 + $0xbdc] ss:$24 sps:$4 sm:$0xff]  }
 0x17b   :  { %2232 = vmatpush2.bf16.msra.mxu0 %v5518_v40  ;;  %v5619_v40 = vld [vmem:[#allocation5 + $0xbe4] ss:$24 sps:$4 sm:$0xff]  }
 0x17c   :  { %2864 = vmatpush2.bf16.msra.mxu1 %v5521_v41  ;;  %2233 = vmatprep.subr.bf16.mxu0 %v5526_v42  ;;  %v5614_v41 = vld [vmem:[#allocation5 + $0xbd8] ss:$24 sps:$4 sm:$0xff]  }
 0x17d   :  { %2865 = vmatprep.subr.bf16.mxu1 %v5529_v43  ;;  %v5617_v42 = vld [vmem:[#allocation5 + $0xbe0] ss:$24 sps:$4 sm:$0xff]   ;;  %v5622_v43 = vld [vmem:[#allocation5 + $0xbac] ss:$24 sps:$4 sm:$0xff]  }
 0x17f   :  { %2234 = vmatpush2.bf16.msra.mxu0 %v5524_v44  ;;  %v5625_v44 = vld [vmem:[#allocation5 + $0xbb4] ss:$24 sps:$4 sm:$0xff]  }
 0x180   :  { %2866 = vmatpush2.bf16.msra.mxu1 %v5527_v45  ;;  %2235 = vmatprep.subr.bf16.mxu0 %v5532_v46  ;;  %v5620_v45 = vld [vmem:[#allocation5 + $0xba8] ss:$24 sps:$4 sm:$0xff]  }
 0x181   :  { %2867 = vmatprep.subr.bf16.mxu1 %v5535_v47  ;;  %v5623_v46 = vld [vmem:[#allocation5 + $0xbb0] ss:$24 sps:$4 sm:$0xff]   ;;  %v6169_v47 = vpop.f32.mrf.mxu1 }
 0x183   :  { %2236 = vmatpush2.bf16.msra.mxu0 %v5530_v49  ;;  %v5628_v49 = vld [vmem:[#allocation5 + $0xb7c] ss:$24 sps:$4 sm:$0xff]  }
 0x184   :  { %2868 = vmatpush2.bf16.msra.mxu1 %v5533_v50  ;;  %2237 = vmatprep.subr.bf16.mxu0 %v5538_v51  ;;  %v5631_v50 = vld [vmem:[#allocation5 + $0xb84] ss:$24 sps:$4 sm:$0xff]   ;;  %v5626_v51 = vld [vmem:[#allocation5 + $0xb78] ss:$24 sps:$4 sm:$0xff]  }
 0x185   :  { %2869 = vmatprep.subr.bf16.mxu1 %v5541_v52  ;;  %v5629_v52 = vld [vmem:[#allocation5 + $0xb80] ss:$24 sps:$4 sm:$0xff]  }
 0x187   :  { %2238 = vmatpush2.bf16.msra.mxu0 %v5536_v53  ;;  %v6171_v53 = vpop.f32.mrf.mxu1 }
 0x188   :  { %2870 = vmatpush2.bf16.msra.mxu1 %v5539_v54  ;;  %2239 = vmatprep.subr.bf16.mxu0 %v5544_v55  ;;  %v5634_v54 = vld [vmem:[#allocation5 + $0xb4c] ss:$24 sps:$4 sm:$0xff]  }
 0x189   :  { %2871 = vmatprep.subr.bf16.mxu1 %v5547_v56  ;;  %v5637_v55 = vld [vmem:[#allocation5 + $0xb54] ss:$24 sps:$4 sm:$0xff]   ;;  %v5632_v56 = vld [vmem:[#allocation5 + $0xb48] ss:$24 sps:$4 sm:$0xff]  }
 0x18b   :  { %2240 = vmatpush2.bf16.msra.mxu0 %v5542_v57  ;;  %v5635_v57 = vld [vmem:[#allocation5 + $0xb50] ss:$24 sps:$4 sm:$0xff]  }
 0x18c   :  { %2872 = vmatpush2.bf16.msra.mxu1 %v5545_v58  ;;  %2241 = vmatprep.subr.bf16.mxu0 %v5550_v59  ;;  %v6173_v58 = vpop.f32.mrf.mxu1  ;;  %v5640_v59 = vld [vmem:[#allocation5 + $0xb1c] ss:$24 sps:$4 sm:$0xff]  }
 0x18d   :  { %2873 = vmatprep.subr.bf16.mxu1 %v5553_v60  ;;  %v5643_v60 = vld [vmem:[#allocation5 + $0xb24] ss:$24 sps:$4 sm:$0xff]  }
 0x18f   :  { %2242 = vmatpush2.bf16.msra.mxu0 %v5548_v61  ;;  %v6175_v61 = vpop.f32.mrf.mxu0 }
 0x190   :  { %2874 = vmatpush2.bf16.msra.mxu1 %v5551_v62  ;;  %2243 = vmatprep.subr.bf16.mxu0 %v5556_v63  ;;  %v5638_v62 = vld [vmem:[#allocation5 + $0xb18] ss:$24 sps:$4 sm:$0xff]  }
 0x191   :  { %2875 = vmatprep.subr.bf16.mxu1 %v5559_v0  ;;  %v5641_v63 = vld [vmem:[#allocation5 + $0xb20] ss:$24 sps:$4 sm:$0xff]   ;;  %v6177_v0 = vpop.f32.mrf.mxu1 }
 0x193   :  { %2244 = vmatpush2.bf16.msra.mxu0 %v5554_v1  ;;  %v5646_v1 = vld [vmem:[#allocation5 + $0xaec] ss:$24 sps:$4 sm:$0xff]  }
 0x194   :  { %2876 = vmatpush2.bf16.msra.mxu1 %v5557_v2  ;;  %2245 = vmatprep.subr.bf16.mxu0 %v5562_v4  ;;  %v5649_v2 = vld [vmem:[#allocation5 + $0xaf4] ss:$24 sps:$4 sm:$0xff]   ;;  %v6179_v4 = vpop.f32.mrf.mxu0 }
 0x195   :  { %2877 = vmatprep.subr.bf16.mxu1 %v5565_v5  ;;  %v5644_v5 = vld [vmem:[#allocation5 + $0xae8] ss:$24 sps:$4 sm:$0xff]  }
 0x197   :  { %2246 = vmatpush2.bf16.msra.mxu0 %v5560_v6  ;;  %v5647_v6 = vld [vmem:[#allocation5 + $0xaf0] ss:$24 sps:$4 sm:$0xff]  }
 0x198   :  { %2878 = vmatpush2.bf16.msra.mxu1 %v5563_v7  ;;  %2890 = vmatprep.subr.bf16.mxu0 %v5568_v8  ;;  %v5652_v8 = vld [vmem:[#allocation5 + $0xabc] ss:$24 sps:$4 sm:$0xff]  }
 0x199   :  { %2933 = vmatprep.subr.bf16.mxu1 %v5571_v9  ;;  %v5655_v9 = vld [vmem:[#allocation5 + $0xac4] ss:$24 sps:$4 sm:$0xff]  }
 0x19a   :  { %2248 = vmatmul.mubr.bf16.vlgmr.msra.gmra.mxu0 %v6159_v12 }
 0x19b   :  { %2880 = vmatmul.mubr.bf16.vlgmr.msra.gmra.mxu1 %v6159_v12  ;;  %2891 = vmatpush1.bf16.msra.mxu0 %v5566_v10  ;;  %v6181_v7 = vpop.f32.mrf.mxu1  ;;  %v6183_v10 = vpop.f32.mrf.mxu0 }
 0x19c   :  { %2934 = vmatpush1.bf16.msra.mxu1 %v5569_v11  ;;  %2892 = vmatprep.subr.bf16.mxu0 %v5574_v13  ;;  %v5650_v11 = vld [vmem:[#allocation5 + $0xab8] ss:$24 sps:$4 sm:$0xff]  }
 0x19d   :  { %2935 = vmatprep.subr.bf16.mxu1 %v5577_v14  ;;  %2922 = vmatprep.mubr.bf16.mxu0 %v6155_v15  ;;  %v5653_v13 = vld [vmem:[#allocation5 + $0xac0] ss:$24 sps:$4 sm:$0xff]   ;;  %v6185_v14 = vpop.f32.mrf.mxu1 }
 0x19e   :  { %2965 = vmatprep.mubr.bf16.mxu1 %v6155_v15  ;;  %v5601_v15 = vld [vmem:[#allocation5 + $0x974] ss:$24 sps:$4 sm:$0xff]  }
 0x19f   :  { %2893 = vmatpush1.bf16.msra.mxu0 %v5572_v16  ;;  %v5658_v16 = vld [vmem:[#allocation5 + $0xa8c] ss:$24 sps:$4 sm:$0xff]  }
 0x1a0   :  { %2936 = vmatpush1.bf16.msra.mxu1 %v5575_v17  ;;  %2894 = vmatprep.subr.bf16.mxu0 %v5580_v18  ;;  %v5661_v17 = vld [vmem:[#allocation5 + $0xa94] ss:$24 sps:$4 sm:$0xff]   ;;  %v6187_v18 = vpop.f32.mrf.mxu0 }
 0x1a1   :  { %2937 = vmatprep.subr.bf16.mxu1 %v5583_v3  ;;  %v5656_v3 = vld [vmem:[#allocation5 + $0xa88] ss:$24 sps:$4 sm:$0xff]  }
 0x1a3   :  { %2895 = vmatpush1.bf16.msra.mxu0 %v5578_v19  ;;  %v5659_v19 = vld [vmem:[#allocation5 + $0xa90] ss:$24 sps:$4 sm:$0xff]  }
 0x1a4   :  { %2938 = vmatpush1.bf16.msra.mxu1 %v5581_v20  ;;  %2896 = vmatprep.subr.bf16.mxu0 %v5586_v21  ;;  %v6189_v20 = vpop.f32.mrf.mxu0  ;;  %v6191_v21 = vpop.f32.mrf.mxu1 }
 0x1a5   :  { %2939 = vmatprep.subr.bf16.mxu1 %v5589_v22  ;;  %v5664_v22 = vld [vmem:[#allocation5 + $0xd54] ss:$24 sps:$4 sm:$0xff]  }
 0x1a7   :  { %2897 = vmatpush1.bf16.msra.mxu0 %v5584_v23  ;;  %v5667_v23 = vld [vmem:[#allocation5 + $0xd5c] ss:$24 sps:$4 sm:$0xff]  }
 0x1a8   :  { %2940 = vmatpush1.bf16.msra.mxu1 %v5587_v48  ;;  %2898 = vmatprep.subr.bf16.mxu0 %v5592_v24  ;;  %v5662_v48 = vld [vmem:[#allocation5 + $0xd50] ss:$24 sps:$4 sm:$0xff]  }
 0x1a9   :  { %2941 = vmatprep.subr.bf16.mxu1 %v5595_v25  ;;  %v5665_v24 = vld [vmem:[#allocation5 + $0xd58] ss:$24 sps:$4 sm:$0xff]   ;;  %v6193_v25 = vpop.f32.mrf.mxu0 }
 0x1ab   :  { %2899 = vmatpush1.bf16.msra.mxu0 %v5590_v26  ;;  %v6195_v26 = vpop.f32.mrf.mxu1 }
 0x1ac   :  { %2942 = vmatpush1.bf16.msra.mxu1 %v5593_v27  ;;  %2900 = vmatprep.subr.bf16.mxu0 %v5598_v28  ;;  %v5670_v27 = vld [vmem:[#allocation5 + $0xd24] ss:$24 sps:$4 sm:$0xff]  }
 0x1ad   :  { %2943 = vmatprep.subr.bf16.mxu1 %v5601_v15  ;;  %v5673_v28 = vld [vmem:[#allocation5 + $0xd2c] ss:$24 sps:$4 sm:$0xff]  }
 0x1af   :  { %2901 = vmatpush1.bf16.msra.mxu0 %v5596_v29 }
 0x1b0   :  { %2944 = vmatpush1.bf16.msra.mxu1 %v5599_v30  ;;  %2902 = vmatprep.subr.bf16.mxu0 %v5604_v31  ;;  %v5668_v30 = vld [vmem:[#allocation5 + $0xd20] ss:$24 sps:$4 sm:$0xff]  }
 0x1b1   :  { %2945 = vmatprep.subr.bf16.mxu1 %v5607_v32  ;;  %v5671_v31 = vld [vmem:[#allocation5 + $0xd28] ss:$24 sps:$4 sm:$0xff]   ;;  %v6203_v32 = vpop.f32.mrf.mxu0 }
 0x1b3   :  { %2903 = vmatpush1.bf16.msra.mxu0 %v5602_v33 }
 0x1b4   :  { %2946 = vmatpush1.bf16.msra.mxu1 %v5605_v34  ;;  %2904 = vmatprep.subr.bf16.mxu0 %v5610_v35  ;;  %v5676_v34 = vld [vmem:[#allocation5 + $0xcf4] ss:$24 sps:$4 sm:$0xff]  }
 0x1b5   :  { %2947 = vmatprep.subr.bf16.mxu1 %v5613_v36  ;;  %v5679_v35 = vld [vmem:[#allocation5 + $0xcfc] ss:$24 sps:$4 sm:$0xff]  }
 0x1b7   :  { %2905 = vmatpush1.bf16.msra.mxu0 %v5608_v37  ;;  %v6209_v37 = vld [vmem:[#allocation2 + $0x4] ss:$8 sps:$4 sm:$0xff]  }
 0x1b8   :  { %2948 = vmatpush1.bf16.msra.mxu1 %v5611_v38  ;;  %2906 = vmatprep.subr.bf16.mxu0 %v5616_v39  ;;  %v5674_v39 = vld [vmem:[#allocation5 + $0xcf0] ss:$24 sps:$4 sm:$0xff]  }
 0x1b9   :  { %2949 = vmatprep.subr.bf16.mxu1 %v5619_v40  ;;  %v5677_v40 = vld [vmem:[#allocation5 + $0xcf8] ss:$24 sps:$4 sm:$0xff]  }
 0x1bb   :  { %2907 = vmatpush2.bf16.msra.mxu0 %v5614_v41  ;;  %v6217_v41 = vpop.f32.mrf.mxu0 }
 0x1bc   :  { %2950 = vmatpush2.bf16.msra.mxu1 %v5617_v42  ;;  %2908 = vmatprep.subr.bf16.mxu0 %v5622_v43  ;;  %v5682_v43 = vld [vmem:[#allocation5 + $0xcc4] ss:$24 sps:$4 sm:$0xff]  }
 0x1bd   :  { %2951 = vmatprep.subr.bf16.mxu1 %v5625_v44  ;;  %v5685_v44 = vld [vmem:[#allocation5 + $0xccc] ss:$24 sps:$4 sm:$0xff]  }
 0x1bf   :  { %2909 = vmatpush2.bf16.msra.mxu0 %v5620_v45 }
 0x1c0   :  { %2952 = vmatpush2.bf16.msra.mxu1 %v5623_v46  ;;  %2910 = vmatprep.subr.bf16.mxu0 %v5628_v49  ;;  %v5680_v46 = vld [vmem:[#allocation5 + $0xcc0] ss:$24 sps:$4 sm:$0xff]  }
 0x1c1   :  { %2953 = vmatprep.subr.bf16.mxu1 %v5631_v50  ;;  %v5683_v49 = vld [vmem:[#allocation5 + $0xcc8] ss:$24 sps:$4 sm:$0xff]   ;;  %v5688_v50 = vld [vmem:[#allocation5 + $0xc94] ss:$24 sps:$4 sm:$0xff]  }
 0x1c3   :  { %2911 = vmatpush2.bf16.msra.mxu0 %v5626_v51  ;;  %v5691_v51 = vld [vmem:[#allocation5 + $0xc9c] ss:$24 sps:$4 sm:$0xff]  }
 0x1c4   :  { %2954 = vmatpush2.bf16.msra.mxu1 %v5629_v52  ;;  %2912 = vmatprep.subr.bf16.mxu0 %v5634_v54  ;;  %v5686_v52 = vld [vmem:[#allocation5 + $0xc90] ss:$24 sps:$4 sm:$0xff]  }
 0x1c5   :  { %2955 = vmatprep.subr.bf16.mxu1 %v5637_v55  ;;  %v5689_v54 = vld [vmem:[#allocation5 + $0xc98] ss:$24 sps:$4 sm:$0xff]   ;;  %v5694_v55 = vld [vmem:[#allocation5 + $0xc64] ss:$24 sps:$4 sm:$0xff]  }
 0x1c7   :  { %2913 = vmatpush2.bf16.msra.mxu0 %v5632_v56  ;;  %v5697_v56 = vld [vmem:[#allocation5 + $0xc6c] ss:$24 sps:$4 sm:$0xff]  }
 0x1c8   :  { %2956 = vmatpush2.bf16.msra.mxu1 %v5635_v57  ;;  %2914 = vmatprep.subr.bf16.mxu0 %v5640_v59  ;;  %v5692_v57 = vld [vmem:[#allocation5 + $0xc60] ss:$24 sps:$4 sm:$0xff]  }
 0x1c9   :  { %2957 = vmatprep.subr.bf16.mxu1 %v5643_v60  ;;  %v5695_v59 = vld [vmem:[#allocation5 + $0xc68] ss:$24 sps:$4 sm:$0xff]   ;;  %v5700_v60 = vld [vmem:[#allocation5 + $0xc34] ss:$24 sps:$4 sm:$0xff]  }
 0x1cb   :  { %2915 = vmatpush2.bf16.msra.mxu0 %v5638_v62  ;;  %v5703_v62 = vld [vmem:[#allocation5 + $0xc3c] ss:$24 sps:$4 sm:$0xff]  }
 0x1cc   :  { %2958 = vmatpush2.bf16.msra.mxu1 %v5641_v63  ;;  %2916 = vmatprep.subr.bf16.mxu0 %v5646_v1  ;;  %v5698_v63 = vld [vmem:[#allocation5 + $0xc30] ss:$24 sps:$4 sm:$0xff]  }
 0x1cd   :  { %2959 = vmatprep.subr.bf16.mxu1 %v5649_v2  ;;  %v5701_v1 = vld [vmem:[#allocation5 + $0xc38] ss:$24 sps:$4 sm:$0xff]   ;;  %v5706_v2 = vld [vmem:[#allocation5 + $0xc04] ss:$24 sps:$4 sm:$0xff]  }
 0x1cf   :  { %2917 = vmatpush2.bf16.msra.mxu0 %v5644_v5  ;;  %v5709_v5 = vld [vmem:[#allocation5 + $0xc0c] ss:$24 sps:$4 sm:$0xff]  }
 0x1d0   :  { %2960 = vmatpush2.bf16.msra.mxu1 %v5647_v6  ;;  %2918 = vmatprep.subr.bf16.mxu0 %v5652_v8  ;;  %v5704_v6 = vld [vmem:[#allocation5 + $0xc00] ss:$24 sps:$4 sm:$0xff]  }
 0x1d1   :  { %2961 = vmatprep.subr.bf16.mxu1 %v5655_v9  ;;  %v5707_v8 = vld [vmem:[#allocation5 + $0xc08] ss:$24 sps:$4 sm:$0xff]   ;;  %v5712_v9 = vld [vmem:[#allocation5 + $0xed4] ss:$24 sps:$4 sm:$0xff]  }
 0x1d3   :  { %2919 = vmatpush2.bf16.msra.mxu0 %v5650_v11  ;;  %v5715_v11 = vld [vmem:[#allocation5 + $0xedc] ss:$24 sps:$4 sm:$0xff]  }
 0x1d4   :  { %2962 = vmatpush2.bf16.msra.mxu1 %v5653_v13  ;;  %2920 = vmatprep.subr.bf16.mxu0 %v5658_v16  ;;  %v5710_v13 = vld [vmem:[#allocation5 + $0xed0] ss:$24 sps:$4 sm:$0xff]  }
 0x1d5   :  { %2963 = vmatprep.subr.bf16.mxu1 %v5661_v17  ;;  %v5713_v16 = vld [vmem:[#allocation5 + $0xed8] ss:$24 sps:$4 sm:$0xff]   ;;  %v5718_v17 = vld [vmem:[#allocation5 + $0xea4] ss:$24 sps:$4 sm:$0xff]  }
 0x1d7   :  { %2921 = vmatpush2.bf16.msra.mxu0 %v5656_v3  ;;  %v5721_v3 = vld [vmem:[#allocation5 + $0xeac] ss:$24 sps:$4 sm:$0xff]  }
 0x1d8   :  { %2964 = vmatpush2.bf16.msra.mxu1 %v5659_v19  ;;  %3565 = vmatprep.subr.bf16.mxu0 %v5664_v22  ;;  %v5716_v19 = vld [vmem:[#allocation5 + $0xea0] ss:$24 sps:$4 sm:$0xff]  }
 0x1d9   :  { %3608 = vmatprep.subr.bf16.mxu1 %v5667_v23  ;;  %v5719_v22 = vld [vmem:[#allocation5 + $0xea8] ss:$24 sps:$4 sm:$0xff]   ;;  %v5724_v23 = vld [vmem:[#allocation5 + $0xe74] ss:$24 sps:$4 sm:$0xff]  }
 0x1da   :  { %2923 = vmatmul.mubr.bf16.vlgmr.msra.gmra.mxu0 %v6159_v12 }
 0x1db   :  { %v6197_v15 = vpop.f32.mrf.mxu1  ;;  %2966 = vmatmul.mubr.bf16.vlgmr.msra.gmra.mxu1 %v6159_v12  ;;  %3566 = vmatpush1.bf16.msra.mxu0 %v5662_v48  ;;  %v5727_v48 = vld [vmem:[#allocation5 + $0xe7c] ss:$24 sps:$4 sm:$0xff]  }
 0x1dc   :  { %v1544_v29 = vmax.f32 %v6189_v20, %v6197_v15  ;;  %3609 = vmatpush1.bf16.msra.mxu1 %v5665_v24  ;;  %3567 = vmatprep.subr.bf16.mxu0 %v5670_v27  ;;  %v5722_v24 = vld [vmem:[#allocation5 + $0xe70] ss:$24 sps:$4 sm:$0xff]  }
 0x1dd   :  { %v6205_v33 = vpop.f32.mrf.mxu1  ;;  %3610 = vmatprep.subr.bf16.mxu1 %v5673_v28  ;;  %3597 = vmatprep.mubr.bf16.mxu0 %v6209_v37  ;;  %v5725_v27 = vld [vmem:[#allocation5 + $0xe78] ss:$24 sps:$4 sm:$0xff]   ;;  %v5730_v28 = vld [vmem:[#allocation5 + $0xe44] ss:$24 sps:$4 sm:$0xff]  }
 0x1de   :  { %v1545_v36 = vmax.f32 %v6193_v25, %v6205_v33  ;;  %3640 = vmatprep.mubr.bf16.mxu1 %v6209_v37  ;;  %v5812_v15 = vld [vmem:[#allocation8 + $0x60] sm:$0xff]   ;;  %v5815_v33 = vld [vmem:[#allocation8 + $0x18] sm:$0xff]  }
 0x1df   :  { %v6213_v12 = vpop.f32.mrf.mxu1  ;;  %3568 = vmatpush1.bf16.msra.mxu0 %v5668_v30  ;;  %v5733_v30 = vld [vmem:[#allocation5 + $0xe4c] ss:$24 sps:$4 sm:$0xff]  }
 0x1e0   :  { %v1550_v38 = vmax.f32 %v6203_v32, %v6213_v12  ;;  %3611 = vmatpush1.bf16.msra.mxu1 %v5671_v31  ;;  %3569 = vmatprep.subr.bf16.mxu0 %v5676_v34  ;;  %v5728_v31 = vld [vmem:[#allocation5 + $0xe40] ss:$24 sps:$4 sm:$0xff]   ;;  %v5813_v25 = vld [vmem:[#allocation8 + $0x20] sm:$0xff]   ;;  %v5818_v12 = vld [vmem:[#allocation8 + $0x48] sm:$0xff]  }
 0x1e1   :  { %v6219_v42 = vpop.f32.mrf.mxu1  ;;  %3612 = vmatprep.subr.bf16.mxu1 %v5679_v35  ;;  %v5731_v34 = vld [vmem:[#allocation5 + $0xe48] ss:$24 sps:$4 sm:$0xff]   ;;  %v5736_v35 = vld [vmem:[#allocation5 + $0xe14] ss:$24 sps:$4 sm:$0xff]  }
 0x1e2   :  { %v1551_v45 = vmax.f32 %v6217_v41, %v6219_v42  ;;  %v5817_v32 = vld [vmem:[#allocation8 + $0x10] sm:$0xff]   ;;  %v5821_v41 = vld [vmem:[#allocation8] sm:$0xff]   ;;  %v5822_v42 = vld [vmem:[#allocation8 + $0xf8] sm:$0xff]  }
 0x1e3   :  { %3570 = vmatpush1.bf16.msra.mxu0 %v5674_v39  ;;  %v5739_v39 = vld [vmem:[#allocation5 + $0xe1c] ss:$24 sps:$4 sm:$0xff]  }
 0x1e4   :  { %3613 = vmatpush1.bf16.msra.mxu1 %v5677_v40  ;;  %3571 = vmatprep.subr.bf16.mxu0 %v5682_v43  ;;  %v5734_v40 = vld [vmem:[#allocation5 + $0xe10] ss:$24 sps:$4 sm:$0xff]  }
 0x1e5   :  { %3614 = vmatprep.subr.bf16.mxu1 %v5685_v44  ;;  %v5737_v43 = vld [vmem:[#allocation5 + $0xe18] ss:$24 sps:$4 sm:$0xff]   ;;  %v5742_v44 = vld [vmem:[#allocation5 + $0xde4] ss:$24 sps:$4 sm:$0xff]  }
 0x1e7   :  { %3572 = vmatpush1.bf16.msra.mxu0 %v5680_v46  ;;  %v5745_v46 = vld [vmem:[#allocation5 + $0xdec] ss:$24 sps:$4 sm:$0xff]  }
 0x1e8   :  { %3615 = vmatpush1.bf16.msra.mxu1 %v5683_v49  ;;  %3573 = vmatprep.subr.bf16.mxu0 %v5688_v50  ;;  %v5740_v49 = vld [vmem:[#allocation5 + $0xde0] ss:$24 sps:$4 sm:$0xff]  }
 0x1e9   :  { %3616 = vmatprep.subr.bf16.mxu1 %v5691_v51  ;;  %v5743_v50 = vld [vmem:[#allocation5 + $0xde8] ss:$24 sps:$4 sm:$0xff]   ;;  %v5748_v51 = vld [vmem:[#allocation5 + $0xdb4] ss:$24 sps:$4 sm:$0xff]  }
 0x1eb   :  { %3574 = vmatpush1.bf16.msra.mxu0 %v5686_v52  ;;  %v5751_v52 = vld [vmem:[#allocation5 + $0xdbc] ss:$24 sps:$4 sm:$0xff]  }
 0x1ec   :  { %3617 = vmatpush1.bf16.msra.mxu1 %v5689_v54  ;;  %3575 = vmatprep.subr.bf16.mxu0 %v5694_v55  ;;  %v5746_v54 = vld [vmem:[#allocation5 + $0xdb0] ss:$24 sps:$4 sm:$0xff]  }
 0x1ed   :  { %3618 = vmatprep.subr.bf16.mxu1 %v5697_v56  ;;  %v5749_v55 = vld [vmem:[#allocation5 + $0xdb8] ss:$24 sps:$4 sm:$0xff]   ;;  %v5754_v56 = vld [vmem:[#allocation5 + $0xd84] ss:$24 sps:$4 sm:$0xff]  }
 0x1ef   :  { %3576 = vmatpush1.bf16.msra.mxu0 %v5692_v57  ;;  %v5757_v57 = vld [vmem:[#allocation5 + $0xd8c] ss:$24 sps:$4 sm:$0xff]  }
 0x1f0   :  { %3619 = vmatpush1.bf16.msra.mxu1 %v5695_v59  ;;  %3577 = vmatprep.subr.bf16.mxu0 %v5700_v60  ;;  %v5752_v59 = vld [vmem:[#allocation5 + $0xd80] ss:$24 sps:$4 sm:$0xff]  }
 0x1f1   :  { %3620 = vmatprep.subr.bf16.mxu1 %v5703_v62  ;;  %v5755_v60 = vld [vmem:[#allocation5 + $0xd88] ss:$24 sps:$4 sm:$0xff]   ;;  %v5760_v62 = vld [vmem:[#allocation5 + $0xd64] ss:$24 sps:$4 sm:$0xff]  }
 0x1f3   :  { %3578 = vmatpush1.bf16.msra.mxu0 %v5698_v63  ;;  %v5758_v63 = vld [vmem:[#allocation5 + $0xd60] ss:$24 sps:$4 sm:$0xff]  }
 0x1f4   :  { %3621 = vmatpush1.bf16.msra.mxu1 %v5701_v1  ;;  %3579 = vmatprep.subr.bf16.mxu0 %v5706_v2  ;;  %v5763_v1 = vld [vmem:[#allocation5 + $0xd34] ss:$24 sps:$4 sm:$0xff]   ;;  %v6223_v2 = vld [vmem:[#allocation2] ss:$8 sps:$4 sm:$0xff]  }
 0x1f5   :  { %3622 = vmatprep.subr.bf16.mxu1 %v5709_v5  ;;  %v5761_v5 = vld [vmem:[#allocation5 + $0xd30] ss:$24 sps:$4 sm:$0xff]  }
 0x1f7   :  { %3580 = vmatpush1.bf16.msra.mxu0 %v5704_v6  ;;  %v5766_v6 = vld [vmem:[#allocation5 + $0xd04] ss:$24 sps:$4 sm:$0xff]  }
 0x1f8   :  { %3623 = vmatpush1.bf16.msra.mxu1 %v5707_v8  ;;  %3581 = vmatprep.subr.bf16.mxu0 %v5712_v9  ;;  %v5764_v8 = vld [vmem:[#allocation5 + $0xd00] ss:$24 sps:$4 sm:$0xff]   ;;  %v5769_v9 = vld [vmem:[#allocation5 + $0xcd4] ss:$24 sps:$4 sm:$0xff]  }
 0x1f9   :  { %3624 = vmatprep.subr.bf16.mxu1 %v5715_v11  ;;  %v5806_v11 = vld [vmem:[#allocation8 + $0x78] sm:$0xff]  }
 0x1fb   :  { %3582 = vmatpush2.bf16.msra.mxu0 %v5710_v13  ;;  %v5807_v13 = vld [vmem:[#allocation8 + $0x38] sm:$0xff]  }
 0x1fc   :  { %3625 = vmatpush2.bf16.msra.mxu1 %v5713_v16  ;;  %3583 = vmatprep.subr.bf16.mxu0 %v5718_v17  ;;  %v5767_v16 = vld [vmem:[#allocation5 + $0xcd0] ss:$24 sps:$4 sm:$0xff]   ;;  %v5772_v17 = vld [vmem:[#allocation5 + $0xca4] ss:$24 sps:$4 sm:$0xff]  }
 0x1fd   :  { %3626 = vmatprep.subr.bf16.mxu1 %v5721_v3  ;;  %v5770_v3 = vld [vmem:[#allocation5 + $0xca0] ss:$24 sps:$4 sm:$0xff]  }
 0x1ff   :  { %3584 = vmatpush2.bf16.msra.mxu0 %v5716_v19  ;;  %v5775_v19 = vld [vmem:[#allocation5 + $0xc74] ss:$24 sps:$4 sm:$0xff]  }
 0x200   :  { %3627 = vmatpush2.bf16.msra.mxu1 %v5719_v22  ;;  %3585 = vmatprep.subr.bf16.mxu0 %v5724_v23  ;;  %v5778_v22 = vld [vmem:[#allocation5 + $0xc44] ss:$24 sps:$4 sm:$0xff]   ;;  %v5776_v23 = vld [vmem:[#allocation5 + $0xc40] ss:$24 sps:$4 sm:$0xff]  }
 0x201   :  { %3628 = vmatprep.subr.bf16.mxu1 %v5727_v48  ;;  %v5781_v48 = vld [vmem:[#allocation5 + $0xc14] ss:$24 sps:$4 sm:$0xff]  }
 0x203   :  { %3586 = vmatpush2.bf16.msra.mxu0 %v5722_v24  ;;  %v5779_v24 = vld [vmem:[#allocation5 + $0xc10] ss:$24 sps:$4 sm:$0xff]  }
 0x204   :  { %3629 = vmatpush2.bf16.msra.mxu1 %v5725_v27  ;;  %3587 = vmatprep.subr.bf16.mxu0 %v5730_v28  ;;  %v5784_v27 = vld [vmem:[#allocation5 + $0xee4] ss:$24 sps:$4 sm:$0xff]   ;;  %v5782_v28 = vld [vmem:[#allocation5 + $0xee0] ss:$24 sps:$4 sm:$0xff]  }
 0x205   :  { %3630 = vmatprep.subr.bf16.mxu1 %v5733_v30  ;;  %v5787_v30 = vld [vmem:[#allocation5 + $0xeb4] ss:$24 sps:$4 sm:$0xff]  }
 0x207   :  { %3588 = vmatpush2.bf16.msra.mxu0 %v5728_v31  ;;  %v5785_v31 = vld [vmem:[#allocation5 + $0xeb0] ss:$24 sps:$4 sm:$0xff]  }
 0x208   :  { %3631 = vmatpush2.bf16.msra.mxu1 %v5731_v34  ;;  %3589 = vmatprep.subr.bf16.mxu0 %v5736_v35  ;;  %v5790_v34 = vld [vmem:[#allocation5 + $0xe84] ss:$24 sps:$4 sm:$0xff]   ;;  %v6228_v35 = vpop.f32.mrf.mxu0 }
 0x209   :  { %3632 = vmatprep.subr.bf16.mxu1 %v5739_v39  ;;  %v5788_v39 = vld [vmem:[#allocation5 + $0xe80] ss:$24 sps:$4 sm:$0xff]  }
 0x20b   :  { %3590 = vmatpush2.bf16.msra.mxu0 %v5734_v40  ;;  %v5793_v40 = vld [vmem:[#allocation5 + $0xe54] ss:$24 sps:$4 sm:$0xff]  }
 0x20c   :  { %3633 = vmatpush2.bf16.msra.mxu1 %v5737_v43  ;;  %3591 = vmatprep.subr.bf16.mxu0 %v5742_v44  ;;  %v6230_v43 = vpop.f32.mrf.mxu0  ;;  %v5791_v44 = vld [vmem:[#allocation5 + $0xe50] ss:$24 sps:$4 sm:$0xff]  }
 0x20d   :  { %3634 = vmatprep.subr.bf16.mxu1 %v5745_v46  ;;  %v5796_v46 = vld [vmem:[#allocation5 + $0xe24] ss:$24 sps:$4 sm:$0xff]  }
 0x20f   :  { %3592 = vmatpush2.bf16.msra.mxu0 %v5740_v49  ;;  %v6232_v49 = vpop.f32.mrf.mxu0 }
 0x210   :  { %3635 = vmatpush2.bf16.msra.mxu1 %v5743_v50  ;;  %3593 = vmatprep.subr.bf16.mxu0 %v5748_v51  ;;  %v5794_v50 = vld [vmem:[#allocation5 + $0xe20] ss:$24 sps:$4 sm:$0xff]   ;;  %v5799_v51 = vld [vmem:[#allocation5 + $0xdf4] ss:$24 sps:$4 sm:$0xff]  }
 0x211   :  { %3636 = vmatprep.subr.bf16.mxu1 %v5751_v52  ;;  %v6234_v52 = vpop.f32.mrf.mxu0 }
 0x213   :  { %3594 = vmatpush2.bf16.msra.mxu0 %v5746_v54  ;;  %v5797_v54 = vld [vmem:[#allocation5 + $0xdf0] ss:$24 sps:$4 sm:$0xff]  }
 0x214   :  { %3637 = vmatpush2.bf16.msra.mxu1 %v5749_v55  ;;  %3595 = vmatprep.subr.bf16.mxu0 %v5754_v56  ;;  %v5802_v56 = vld [vmem:[#allocation5 + $0xdc4] ss:$24 sps:$4 sm:$0xff]  }
 0x215   :  { %3638 = vmatprep.subr.bf16.mxu1 %v5757_v57  ;;  %v5800_v57 = vld [vmem:[#allocation5 + $0xdc0] ss:$24 sps:$4 sm:$0xff]  }
 0x217   :  { %3596 = vmatpush2.bf16.msra.mxu0 %v5752_v59 }
 0x218   :  { %3639 = vmatpush2.bf16.msra.mxu1 %v5755_v60  ;;  %3651 = vmatprep.subr.bf16.mxu0 %v5760_v62  ;;  %v5805_v60 = vld [vmem:[#allocation5 + $0xd94] ss:$24 sps:$4 sm:$0xff]   ;;  %v5803_v62 = vld [vmem:[#allocation5 + $0xd90] ss:$24 sps:$4 sm:$0xff]  }
 0x219   :  { %4972 = vmatprep.subr.bf16.mxu1 %v5806_v11 }
 0x21a   :  { %3598 = vmatmul.mubr.bf16.vlgmr.msra.gmra.mxu0 %v6223_v2  ;;  %v6236_v55 = vpop.f32.mrf.mxu0 }
 0x21b   :  { %3641 = vmatmul.mubr.bf16.vlgmr.msra.gmra.mxu1 %v6223_v2  ;;  %3652 = vmatpush1.bf16.msra.mxu0 %v5758_v63 }
 0x21c   :  { %3683 = vmatprep.mubr.bf16.mxu0 %v6209_v37  ;;  %3653 = vmatprep.subr.bf16.mxu0 %v5763_v1  ;;  %v5773_v37 = vld [vmem:[#allocation5 + $0xc70] ss:$24 sps:$4 sm:$0xff]   ;;  %v6238_v59 = vpop.f32.mrf.mxu0 }
 0x21d   :  { %4973 = vmatpush3.bf16.msra.mxu1 %v5807_v13 }
 0x21e   :  { %v6240_v63 = vpop.f32.mrf.mxu0 }
 0x21f   :  { %3654 = vmatpush1.bf16.msra.mxu0 %v5761_v5  ;;  %v5808_v5 = vld [vmem:[#allocation8 + $0x70] sm:$0xff]  }
 0x220   :  { %3655 = vmatprep.subr.bf16.mxu0 %v5766_v6  ;;  %v6242_v1 = vpop.f32.mrf.mxu0  ;;  %v5809_v6 = vld [vmem:[#allocation8 + $0x30] sm:$0xff]   ;;  %4974 = vmatprep.subr.bf16.mxu1 %v5808_v5 }
 0x221   :  { %4975 = vmatpush3.bf16.msra.mxu1 %v5809_v6  ;;  %v5844_v6 = vld [vmem:[#allocation8 + $0x160] sm:$0xff]  }
 0x223   :  { %3656 = vmatpush1.bf16.msra.mxu0 %v5764_v8 }
 0x224   :  { %3657 = vmatprep.subr.bf16.mxu0 %v5769_v9 }
 0x227   :  { %3658 = vmatpush1.bf16.msra.mxu0 %v5767_v16  ;;  %v5810_v16 = vld [vmem:[#allocation8 + $0x68] sm:$0xff]  }
 0x228   :  { %3659 = vmatprep.subr.bf16.mxu0 %v5772_v17  ;;  %4976 = vmatprep.subr.bf16.mxu1 %v5810_v16  ;;  %v5847_v16 = vld [vmem:[#allocation8 + $0x118] sm:$0xff]  }
 0x22b   :  { %3660 = vmatpush1.bf16.msra.mxu0 %v5770_v3  ;;  %v5811_v3 = vld [vmem:[#allocation8 + $0x28] sm:$0xff]  }
 0x22c   :  { %3661 = vmatprep.subr.bf16.mxu0 %v5775_v19  ;;  %4977 = vmatpush3.bf16.msra.mxu1 %v5811_v3  ;;  %v5849_v3 = vld [vmem:[#allocation8 + $0x110] sm:$0xff]  }
 0x22d   :  { %4978 = vmatprep.subr.bf16.mxu1 %v5812_v15  ;;  %v5851_v15 = vld [vmem:[#allocation8 + $0x108] sm:$0xff]  }
 0x22f   :  { %3662 = vmatpush1.bf16.msra.mxu0 %v5773_v37  ;;  %v5820_v37 = vld [vmem:[#allocation8 + $0x40] sm:$0xff]  }
 0x230   :  { %3663 = vmatprep.subr.bf16.mxu0 %v5778_v22  ;;  %4979 = vmatpush3.bf16.msra.mxu1 %v5813_v25  ;;  %v5852_v25 = vld [vmem:[#allocation8 + $0x140] sm:$0xff]  }
 0x233   :  { %3664 = vmatpush1.bf16.msra.mxu0 %v5776_v23 }
 0x234   :  { %3665 = vmatprep.subr.bf16.mxu0 %v5781_v48 }
 0x237   :  { %3666 = vmatpush1.bf16.msra.mxu0 %v5779_v24 }
 0x238   :  { %3667 = vmatprep.subr.bf16.mxu0 %v5784_v27 }
 0x23b   :  { %3668 = vmatpush2.bf16.msra.mxu0 %v5782_v28 }
 0x23c   :  { %3669 = vmatprep.subr.bf16.mxu0 %v5787_v30  ;;  %v5838_v30 = vld [vmem:[#allocation8 + $0x178] sm:$0xff]  }
 0x23f   :  { %3670 = vmatpush2.bf16.msra.mxu0 %v5785_v31  ;;  %v5839_v31 = vld [vmem:[#allocation8 + $0x138] sm:$0xff]  }
 0x240   :  { %3671 = vmatprep.subr.bf16.mxu0 %v5790_v34 }
 0x243   :  { %3672 = vmatpush2.bf16.msra.mxu0 %v5788_v39 }
 0x244   :  { %3673 = vmatprep.subr.bf16.mxu0 %v5793_v40  ;;  %v5840_v40 = vld [vmem:[#allocation8 + $0x170] sm:$0xff]  }
 0x247   :  { %3674 = vmatpush2.bf16.msra.mxu0 %v5791_v44 }
 0x248   :  { %3675 = vmatprep.subr.bf16.mxu0 %v5796_v46  ;;  %v5841_v46 = vld [vmem:[#allocation8 + $0x130] sm:$0xff]  }
 0x24b   :  { %3676 = vmatpush2.bf16.msra.mxu0 %v5794_v50 }
 0x24c   :  { %3677 = vmatprep.subr.bf16.mxu0 %v5799_v51 }
 0x24f   :  { %3678 = vmatpush2.bf16.msra.mxu0 %v5797_v54 }
 0x250   :  { %3679 = vmatprep.subr.bf16.mxu0 %v5802_v56  ;;  %v5842_v56 = vld [vmem:[#allocation8 + $0x168] sm:$0xff]  }
 0x253   :  { %3680 = vmatpush2.bf16.msra.mxu0 %v5800_v57 }
 0x254   :  { %3681 = vmatprep.subr.bf16.mxu0 %v5805_v60  ;;  %v5843_v60 = vld [vmem:[#allocation8 + $0x128] sm:$0xff]  }
 0x257   :  { %3682 = vmatpush2.bf16.msra.mxu0 %v5803_v62 }
 0x258   :  { %5016 = vmatprep.subr.bf16.mxu0 %v5838_v30  ;;  %v1546_v30 = vmax.f32 %v6183_v10, %v6191_v21 }
 0x25a   :  { %v2249_v8 = vpop.f32.mrf.mxu0  ;;  %3684 = vmatmul.mubr.bf16.vlgmr.msra.gmra.mxu0 %v6223_v2  ;;  %v2264_v21 = vmax.f32 %v1546_v30, %v6240_v63 }
 0x25b   :  { %v6248_v9 = vmax.f32 %v1544_v29, %v2249_v8  ;;  %v5814_v29 = vld [vmem:[#allocation8 + $0x58] sm:$0xff]   ;;  %5017 = vmatpush3.bf16.msra.mxu0 %v5839_v31  ;;  %v5845_v8 = vld [vmem:[#allocation8 + $0x120] sm:$0xff]   ;;  %v1547_v31 = vmax.f32 %v6187_v18, %v6195_v26 }
 0x25c   :  { %v2251_v11 = vpop.f32.mrf.mxu0  ;;  %4980 = vmatprep.subr.bf16.mxu1 %v5814_v29  ;;  %5018 = vmatprep.subr.bf16.mxu0 %v5840_v40  ;;  %v5853_v29 = vld [vmem:[#allocation8 + $0x100] sm:$0xff]   ;;  %v1543_v40 = vmax.f32 %v6171_v53, %v6230_v43 }
 0x25d   :  { %v6253_v13 = vmax.f32 %v1545_v36, %v2251_v11  ;;  %4981 = vmatpush3.bf16.msra.mxu1 %v5815_v33  ;;  %v5816_v36 = vld [vmem:[#allocation8 + $0x50] sm:$0xff]   ;;  %v5846_v11 = vld [vmem:[#allocation8 + $0x158] sm:$0xff]   ;;  %v2265_v26 = vmax.f32 %v1547_v31, %v6242_v1 }
 0x25e   :  { %v2253_v17 = vpop.f32.mrf.mxu0  ;;  %4982 = vmatprep.subr.bf16.mxu1 %v5816_v36 }
 0x25f   :  { %v6258_v2 = vmax.f32 %v1550_v38, %v2253_v17  ;;  %v5819_v38 = vld [vmem:[#allocation8 + $0x8] sm:$0xff]   ;;  %5019 = vmatpush3.bf16.msra.mxu0 %v5841_v46  ;;  %v5848_v17 = vld [vmem:[#allocation8 + $0x150] sm:$0xff]  }
 0x260   :  { %v2255_v19 = vpop.f32.mrf.mxu0  ;;  %5020 = vmatprep.subr.bf16.mxu0 %v5842_v56  ;;  %v1549_v56 = vmax.f32 %v6177_v0, %v6234_v52 }
 0x261   :  { %v6263_v20 = vmax.f32 %v1551_v45, %v2255_v19  ;;  %4983 = vmatpush3.bf16.msra.mxu1 %v5817_v32  ;;  %v6265_v45 = vpop.f32.mrf.mxu1  ;;  %v5850_v19 = vld [vmem:[#allocation8 + $0x148] sm:$0xff]   ;;  %v3708_v32 = vlaneseq }
 0x262   :  { %4984 = vmatprep.subr.bf16.mxu1 %v5818_v12 }
 0x263   :  { %v6267_v22 = vpop.f32.mrf.mxu1  ;;  %5021 = vmatpush3.bf16.msra.mxu0 %v5843_v60  ;;  %v6317_v60 = vld [vmem:[#allocation7] sm:$0x3f] }
 0x264   :  { %5022 = vmatprep.subr.bf16.mxu0 %v5844_v6  ;;  %v2261_v53 = vmax.f32 %v1543_v40, %v6267_v22 }
 0x265   :  { %4985 = vmatpush3.bf16.msra.mxu1 %v5819_v38  ;;  %v6269_v23 = vpop.f32.mrf.mxu1  ;;  %v6301_v38 = vshrl.u32 %v3708_v32, 7 }
 0x266   :  { %4986 = vmatprep.subr.bf16.mxu1 %v5820_v37  ;;  %v1540_v37 = vmax.f32 %v6175_v61, %v6181_v7 }
 0x267   :  { %v6271_v48 = vpop.f32.mrf.mxu1  ;;  %5023 = vmatpush3.bf16.msra.mxu0 %v5845_v8  ;;  %v3710_v46 = vsub.s32 0, %v6301_v38  ;;  %v3714_v10 = vsub.s32 1, %v6301_v38 }
 0x268   :  { %5024 = vmatprep.subr.bf16.mxu0 %v5846_v11  ;;  %v2258_v61 = vmax.f32 %v1540_v37, %v6236_v55  ;;  %v2267_v0 = vmax.f32 %v1549_v56, %v6271_v48 }
 0x269   :  { %4987 = vmatpush3.bf16.msra.mxu1 %v5821_v41  ;;  %v6273_v24 = vpop.f32.mrf.mxu1  ;;  %v1541_v41 = vmax.f32 %v6179_v4, %v6185_v14  ;;  %v3722_v14 = vsub.s32 3, %v6301_v38  ;;  %v3715_v63 = vrot.slane %v6317_v60, %v3714_v10  ;;  %v1548_v10 = vmax.f32 %v6173_v58, %v6232_v49 }
 0x26a   :  { %4994 = vmatprep.subr.bf16.mxu1 %v5822_v42  ;;  %v2976_v43 = vmax.f32 %v2258_v61, %v6273_v24  ;;  %v5824_v61 = vld [vmem:[#allocation8 + $0xf0] sm:$0xff]  }
 0x26b   :  { %v6275_v27 = vpop.f32.mrf.mxu1  ;;  %5025 = vmatpush3.bf16.msra.mxu0 %v5847_v16  ;;  %v2259_v18 = vmax.f32 %v1541_v41, %v6238_v59  ;;  %v3711_v16 = vrot.slane %v6317_v60, %v3710_v46  ;;  %v3723_v1 = vrot.slane %v6317_v60, %v3722_v14 }
 0x26c   :  { %5026 = vmatprep.subr.bf16.mxu0 %v5848_v17 }
 0x26d   :  { %v6277_v28 = vpop.f32.mrf.mxu1  ;;  %v2977_v6 = vmax.f32 %v2259_v18, %v6275_v27  ;;  %v1542_v18 = vmax.f32 %v6169_v47, %v6228_v35  ;;  %v5828_v47 = vld [vmem:[#allocation8 + $0xe0] sm:$0xff]  }
 0x26e   :  { %v2982_v8 = vmax.f32 %v2264_v21, %v6277_v28  ;;  %v5825_v21 = vld [vmem:[#allocation8 + $0xb0] sm:$0xff]  }
 0x26f   :  { %v6279_v34 = vpop.f32.mrf.mxu1  ;;  %5027 = vmatpush3.bf16.msra.mxu0 %v5849_v3 }
 0x270   :  { %5028 = vmatprep.subr.bf16.mxu0 %v5850_v19  ;;  %v2983_v59 = vmax.f32 %v2265_v26, %v6279_v34  ;;  %v5826_v26 = vld [vmem:[#allocation8 + $0xe8] sm:$0xff]  }
 0x273   :  { %5029 = vmatpush3.bf16.msra.mxu0 %v5851_v15 }
 0x274   :  { %5030 = vmatprep.subr.bf16.mxu0 %v5852_v25 }
 0x277   :  { %5031 = vmatpush3.bf16.msra.mxu0 %v5853_v29 }
 0x29a   :  { %v6297_v33 = vpop.f32.mrf.mxu0 }
 0x29b   :  { %v6281_v39 = vpop.f32.mrf.mxu1 }
 0x29c   :  { %v2980_v44 = vmax.f32 %v6248_v9, %v6281_v39  ;;  %v2926_v36 = vpop.f32.mrf.mxu0 }
 0x29d   :  { %v6285_v50 = vpop.f32.mrf.mxu1  ;;  %v2979_v11 = vmax.f32 %v2261_v53, %v2926_v36  ;;  %v2266_v53 = vmax.f32 %v1548_v10, %v6269_v23 }
 0x29e   :  { %v2981_v51 = vmax.f32 %v6253_v13, %v6285_v50  ;;  %v6299_v12 = vpop.f32.mrf.mxu0 }
 0x29f   :  { %v6289_v54 = vpop.f32.mrf.mxu1 }
 0x2a0   :  { %v2986_v57 = vmax.f32 %v6258_v2, %v6289_v54  ;;  %v2930_v42 = vpop.f32.mrf.mxu0  ;;  %v6069_v2 = vmov 0.0   ;;  %v5855_v54 = vld [vmem:[#allocation11 + $0x30] sm:$0xff]  }
 0x2a1   :  { %v6293_v62 = vpop.f32.mrf.mxu1  ;;  %v2985_v3 = vmax.f32 %v2267_v0, %v2930_v42  ;;  %v5823_v42 = vld [vmem:[#allocation8 + $0xb8] sm:$0xff]   ;;  %v2260_v0 = vmax.f32 %v1542_v18, %v6265_v45 }
 0x2a2   :  { %v2987_v5 = vmax.f32 %v6263_v20, %v6293_v62  ;;  %v5830_v45 = vld [vmem:[#allocation8 + $0xd8] sm:$0xff]   ;;  %v5856_v20 = vld [vmem:[#allocation11 + $0x28] sm:$0xff]  }
 0x2a3   :  { %v2978_v58 = vmax.f32 %v2260_v0, %v6297_v33  ;;  %v5832_v33 = vld [vmem:[#allocation8 + $0xd0] sm:$0xff]   ;;  %v5858_v62 = vld [vmem:[#allocation11 + $0x18] sm:$0xff]  }
 0x2da   :  { %v3599_v7 = vpop.f32.mrf.mxu0 }
 0x2db   :  { %v6319_v4 = vpop.f32.mrf.mxu1  ;;  %v3694_v22 = vmax.f32 %v2976_v43, %v3599_v7  ;;  %v2984_v43 = vmax.f32 %v2266_v53, %v6299_v12 }
 0x2dc   :  { %v3601_v52 = vpop.f32.mrf.mxu0  ;;  %v3696_v35 = vmax.f32 %v2978_v58, %v6319_v4  ;;  %v5835_v4 = vld [vmem:[#allocation8 + $0x88] sm:$0xff]  }
 0x2dd   :  { %v3644_v55 = vpop.f32.mrf.mxu1  ;;  %v3695_v24 = vmax.f32 %v2977_v6, %v3601_v52  ;;  %v3738_v32 = vadd.f32 %v3711_v16, %v3694_v22  ;;  %v3718_v52 = vsub.s32 2, %v6301_v38  ;;  %v5834_v22 = vld [vmem:[#allocation8 + $0xc8] sm:$0xff]  }
 0x2de   :  { %v3603_v17 = vpop.f32.mrf.mxu0  ;;  %v3697_v19 = vmax.f32 %v2979_v11, %v3644_v55  ;;  %v5827_v55 = vld [vmem:[#allocation8 + $0xa8] sm:$0xff]  }
 0x2df   :  { %v3646_v48 = vpop.f32.mrf.mxu1  ;;  %v3700_v15 = vmax.f32 %v2982_v8, %v3603_v17  ;;  %v3739_v37 = vadd.f32 %v3715_v63, %v3695_v24  ;;  %v3719_v23 = vrot.slane %v6317_v60, %v3718_v52  ;;  %v5829_v8 = vld [vmem:[#allocation8 + $0xa0] sm:$0xff]   ;;  %v3730_v24 = vsub.s32 5, %v6301_v38 }
 0x2e0   :  { %v3605_v25 = vpop.f32.mrf.mxu0  ;;  %v3741_v41 = vadd.f32 %v3723_v1, %v3697_v19  ;;  %v3702_v49 = vmax.f32 %v2984_v43, %v3646_v48  ;;  %v3726_v48 = vsub.s32 4, %v6301_v38 }
 0x2e1   :  { %v3648_v27 = vpop.f32.mrf.mxu1  ;;  %v3744_v29 = vadd.f32 %v3711_v16, %v3700_v15  ;;  %v3701_v28 = vmax.f32 %v2983_v59, %v3605_v25  ;;  %v3740_v11 = vadd.f32 %v3719_v23, %v3696_v35  ;;  %v5831_v16 = vld [vmem:[#allocation8 + $0x98] sm:$0xff]   ;;  %v5833_v59 = vld [vmem:[#allocation8 + $0x90] sm:$0xff]  }
 0x2e2   :  { %v3703_v36 = vmax.f32 %v2985_v3, %v3648_v27  ;;  %v3746_v6 = vadd.f32 %v3719_v23, %v3702_v49  ;;  %v3727_v25 = vrot.slane %v6317_v60, %v3726_v48 }
 0x2e3   :  { %v3745_v34 = vadd.f32 %v3715_v63, %v3701_v28  ;;  %v3750_v31 = vpack.c.bf16 %v3744_v29, %v3738_v32  ;;  %v5836_v63 = vld [vmem:[#allocation8 + $0xc0] sm:$0xff]   ;;  %v3731_v28 = vrot.slane %v6317_v60, %v3730_v24  ;;  %v5860_v60 = vld [vmem:[#allocation11 + $0x8] sm:$0xff]  }
 0x2e4   :  { %v3747_v30 = vadd.f32 %v3723_v1, %v3703_v36  ;;  %v3752_v12 = vpack.c.bf16 %v3746_v6, %v3740_v11  ;;  %v5837_v1 = vld [vmem:[#allocation8 + $0x80] sm:$0xff]  }
 0x2e5   :  { %v3751_v40 = vpack.c.bf16 %v3745_v34, %v3739_v37 }
 0x2e6   :  { %v3753_v46 = vpack.c.bf16 %v3747_v30, %v3741_v41  ;;  %v5861_v30 = vld [vmem:[#allocation11] sm:$0xff]  }
 0x2e7   :  { %5862 = vtanh.bf16 %v3751_v40 }
 0x2e8   :  { %5864 = vtanh.bf16 %v3750_v31 }
 0x2e9   :  { %5866 = vtanh.bf16 %v3753_v46 }
 0x2ea   :  { %5868 = vtanh.bf16 %v3752_v12 }
 0x2f5   :  { %v5863_v56 = vpop.eup %5862 }
 0x2f6   :  { %v5865_v7 = vpop.eup %5864  ;;  %4185 = vmatprep.mubr.bf16.mxu1 %v5863_v56 }
 0x2f7   :  { %v5867_v14 = vpop.eup %5866  ;;  %4186 = vmatmul.mubr.bf16.vlgmr.msra.gmra.mxu1 %v5865_v7 }
 0x2f8   :  { %4995 = vmatpush3.bf16.msra.mxu1 %v5823_v42  ;;  %4226 = vmatprep.mubr.bf16.mxu1 %v5867_v14  ;;  %v5869_v17 = vpop.eup %5868  ;;  %v4905_v14 = vld [vmem:[#allocation10] ss:$0 sm:$0xff] }
 0x2f9   :  { %4996 = vmatprep.subr.bf16.mxu1 %v5824_v61 }
 0x2fc   :  { %4997 = vmatpush3.bf16.msra.mxu1 %v5825_v21 }
 0x2fd   :  { %4998 = vmatprep.subr.bf16.mxu1 %v5826_v26 }
 0x300   :  { %4999 = vmatpush3.bf16.msra.mxu1 %v5827_v55 }
 0x301   :  { %5000 = vmatprep.subr.bf16.mxu1 %v5828_v47 }
 0x304   :  { %5001 = vmatpush3.bf16.msra.mxu1 %v5829_v8 }
 0x305   :  { %5002 = vmatprep.subr.bf16.mxu1 %v5830_v45 }
 0x308   :  { %5003 = vmatpush3.bf16.msra.mxu1 %v5831_v16 }
 0x309   :  { %5004 = vmatprep.subr.bf16.mxu1 %v5832_v33  ;;  %v4954_v33 = vld [vmem:[#allocation13] ss:$0 sm:$0xff] }
 0x30c   :  { %5005 = vmatpush3.bf16.msra.mxu1 %v5833_v59 }
 0x30d   :  { %5006 = vmatprep.subr.bf16.mxu1 %v5834_v22 }
 0x310   :  { %5007 = vmatpush3.bf16.msra.mxu1 %v5835_v4 }
 0x311   :  { %5008 = vmatprep.subr.bf16.mxu1 %v5836_v63 }
 0x314   :  { %5009 = vmatpush3.bf16.msra.mxu1 %v5837_v1 }
 0x315   :  { %5047 = vmatprep.subr.bf16.mxu1 %v6069_v2 }
 0x317   :  { %4227 = vmatmul.mubr.bf16.vlgmr.msra.gmra.mxu1 %v5869_v17 }
 0x318   :  { %5063 = vmatprep.mubr.msk.bf16.mxu1 %vm6070_vm0, %v6069_v2 }
 0x31a   :  { %v3685_v3 = vpop.f32.mrf.mxu0 }
 0x31b   :  { %v3698_v15 = vmax.f32 %v2980_v44, %v3685_v3 }
 0x31c   :  { %v3687_v19 = vpop.f32.mrf.mxu0 }
 0x31d   :  { %v3699_v29 = vmax.f32 %v2981_v51, %v3687_v19  ;;  %v3742_v38 = vadd.f32 %v3727_v25, %v3698_v15  ;;  %v5854_v51 = vld [vmem:[#allocation11 + $0x38] sm:$0xff]  }
 0x31e   :  { %v3689_v27 = vpop.f32.mrf.mxu0  ;;  %5048 = vmatpush3.bf16.msra.mxu1 %v5854_v51 }
 0x31f   :  { %v3704_v36 = vmax.f32 %v2986_v57, %v3689_v27  ;;  %v3743_v39 = vadd.f32 %v3731_v28, %v3699_v29  ;;  %5049 = vmatprep.subr.bf16.mxu1 %v6069_v2  ;;  %v5857_v57 = vld [vmem:[#allocation11 + $0x20] sm:$0xff]  }
 0x320   :  { %v3691_v32 = vpop.f32.mrf.mxu0 }
 0x321   :  { %v3748_v37 = vadd.f32 %v3727_v25, %v3704_v36  ;;  %v3705_v9 = vmax.f32 %v2987_v5, %v3691_v32  ;;  %v5859_v5 = vld [vmem:[#allocation11 + $0x10] sm:$0xff]  }
 0x322   :  { %5050 = vmatpush3.bf16.msra.mxu1 %v5855_v54 }
 0x323   :  { %v3754_v44 = vpack.c.bf16 %v3748_v37, %v3742_v38  ;;  %v3749_v41 = vadd.f32 %v3731_v28, %v3705_v9  ;;  %5051 = vmatprep.subr.bf16.mxu1 %v6069_v2 }
 0x325   :  { %v3755_v34 = vpack.c.bf16 %v3749_v41, %v3743_v39 }
 0x326   :  { %5052 = vmatpush3.bf16.msra.mxu1 %v5856_v20 }
 0x327   :  { %5870 = vtanh.bf16 %v3755_v34  ;;  %5053 = vmatprep.subr.bf16.mxu1 %v6069_v2 }
 0x328   :  { %5872 = vtanh.bf16 %v3754_v44 }
 0x32a   :  { %5054 = vmatpush3.bf16.msra.mxu1 %v5857_v57 }
 0x32b   :  { %5055 = vmatprep.subr.bf16.mxu1 %v6069_v2 }
 0x32e   :  { %5056 = vmatpush3.bf16.msra.mxu1 %v5858_v62 }
 0x32f   :  { %5057 = vmatprep.subr.bf16.mxu1 %v6069_v2 }
 0x332   :  { %5058 = vmatpush3.bf16.msra.mxu1 %v5859_v5 }
 0x333   :  { %5059 = vmatprep.subr.bf16.mxu1 %v6069_v2 }
 0x335   :  { %v5871_v13 = vpop.eup %5870 }
 0x336   :  { %v5873_v50 = vpop.eup %5872  ;;  %4267 = vmatprep.mubr.bf16.mxu0 %v5871_v13  ;;  %5060 = vmatpush3.bf16.msra.mxu1 %v5860_v60 }
 0x337   :  { %4268 = vmatmul.mubr.bf16.vlgmr.msra.gmra.mxu0 %v5873_v50  ;;  %5061 = vmatprep.subr.bf16.mxu1 %v6069_v2 }
 0x33a   :  { %5062 = vmatpush3.bf16.msra.mxu1 %v5861_v30 }
 0x3b7   :  { %v4988_v31 = vpop.f32.mrf.mxu1 }
 0x3b9   :  { %v4989_v40 = vpop.f32.mrf.mxu1 }
 0x3ba   :  { %v4990_v10 = vadd.f32 %v4989_v40, %v4988_v31 }
 0x3bb   :  { %v4991_v46 = vpop.f32.mrf.mxu1 }
 0x3bc   :  { %v4188_v0 = vadd.f32 %v4990_v10, %v4905_v14 }
 0x3bd   :  { %v4992_v42 = vpop.f32.mrf.mxu1 }
 0x3be   :  { %v4993_v26 = vadd.f32 %v4992_v42, %v4991_v46 }
 0x3c0   :  { %v4191_v47 = vadd.f32 %v4993_v26, %v4905_v14 }
 0x3d7   :  { %v5010_v56 = vpop.f32.mrf.mxu1 }
 0x3d9   :  { %v5011_v61 = vpop.f32.mrf.mxu1 }
 0x3da   :  { %v5012_v18 = vadd.f32 %v5011_v61, %v5010_v56 }
 0x3db   :  { %v5013_v7 = vpop.f32.mrf.mxu1 }
 0x3dc   :  { %v4229_v49 = vadd.f32 %v5012_v18, %v4188_v0 }
 0x3dd   :  { %v5014_v53 = vpop.f32.mrf.mxu1 }
 0x3de   :  { %v5015_v52 = vadd.f32 %v5014_v53, %v5013_v7 }
 0x3e0   :  { %v4232_v6 = vadd.f32 %v5015_v52, %v4191_v47 }
 0x3f7   :  { %v5032_v21 = vpop.f32.mrf.mxu0 }
 0x3f9   :  { %v5033_v43 = vpop.f32.mrf.mxu0 }
 0x3fa   :  { %v5034_v58 = vadd.f32 %v5033_v43, %v5032_v21 }
 0x3fb   :  { %v5035_v55 = vpop.f32.mrf.mxu0 }
 0x3fc   :  { %v4270_v35 = vadd.f32 %v5034_v58, %v4229_v49 }
 0x3fd   :  { %v5036_v23 = vpop.f32.mrf.mxu0 }
 0x3fe   :  { %v5037_v8 = vadd.f32 %v5036_v23, %v5035_v55  ;;  %5874 = vtanh.f32 %v4270_v35 }
 0x400   :  { %v4273_v45 = vadd.f32 %v5037_v8, %v4232_v6 }
 0x402   :  { %5876 = vtanh.f32 %v4273_v45 }
 0x40b   :  { %v5875_v11 = vpop.eup %5874 }
 0x40f   :  { %v5877_v12 = vpop.eup %5876 }
 0x410   :  { %v4278_v16 = vpack.c.bf16 %v5877_v12, %v5875_v11 }
 0x412   :  { %5064 = vmatmul.mubr.bf16.vlgmr.msra.gmra.mxu1 %v4278_v16 }
 0x4d2   :  { %v4384_v59 = vpop.f32.mrf.mxu1 }
 0x4d3   :  { %v4385_v22 = vadd.f32 %v4954_v33, %v4384_v59 }
 0x4d4   :  { %v5065_v4 = vpop.f32.mrf.mxu1 }
 0x4d5   :  { %5878 = vtanh.f32 %v4385_v22 }
 0x4d6   :  { %v4387_v63 = vpop.f32.mrf.mxu1 }
 0x4d7   :  { %v4388_v1 = vadd.f32 %v4954_v33, %v4387_v63 }
 0x4d8   :  { %v5066_v17 = vpop.f32.mrf.mxu1 }
 0x4d9   :  { %5880 = vtanh.f32 %v4388_v1 }
 0x4e2   :  { %v5879_v48 = vpop.eup %5878 }
 0x4e6   :  { %v5881_v3 = vpop.eup %5880 }
 0x4e7   :  { %v4970_v24 = vpack.c.bf16 %v5881_v3, %v5879_v48 }
 0x4e9   :  { %4971 = vst [vmem:[#allocation14] sm:$0xff] %v4970_v24  }
 0x4ea   :  { %6037 = shalt.err (!%p6034_p11)
}
 0x4eb   :  { %4414 = dma.vmem_to_hbm [thread:$0]  %s4409_s6, 128, %s6375_s7, [#allocation4], %s6060_s11, %s6060_s11, %s6061_s12  }
 0x4ec   :  { %6054 = dma.done.wait [#allocation4], 128  }
 0x4ed   :  { %6055 = vsyncadd [#allocation4], 4294967168 }
 0x4ee   :  { %4418 = vsyncpa [#allocation3], 1 }
 0x4ef   :  { %4419 = vsyncpa [#allocation6], 1 }
 0x4f0   :  { %4420 = vsyncpa [#allocation9], 1 }
 0x4f1   :  { %4421 = vsyncpa [#allocation12], 1 }
 0x4f2   :  { %4422 = vsyncpa [#allocation4], 1 }

</bundles_post_ra>
